<compile_context>
chip_gen: v5e
topology: v5e:2x2
jax: 0.10.0
libtpu: 0.0.40
codegen_flags: <defaults>
</compile_context>

<pallas_src>
import functools
import types

import jax
import jax.numpy as jnp
from jax.experimental import pallas as pl
from jax.experimental.pallas import tpu as pltpu

_LANE = 128
_SUBLANE = 8


def _round_up(x, m):
    return ((x + m - 1) // m) * m


def _default_stacked_k():
    """Stack x|h into one K=2*128 dot per layer only on 256-deep-MXU chips."""
    try:
        kind = jax.devices()[0].device_kind.lower()
    except Exception:
        return True
    return not any(tag in kind for tag in ("v2", "v3", "v4", "v5"))


# ---------------------------------------------------------------------------
# Kernel: T fused decode steps of Embedding(+fold) -> L GRU cells -> Linear.
# ---------------------------------------------------------------------------
def _gru_decode_kernel(num_layers, hidden_pad, v_pad, stacked,
                       ids_ref, h0_ref, *rest):
    L, HP, VP = num_layers, hidden_pad, v_pad
    npl = 3 if stacked else 4
    layer_refs = rest[: npl * L]
    fcw_ref = rest[npl * L]          # (HP, OP) bf16
    fcb_ref = rest[npl * L + 1]      # (1, OP)  f32
    logits_ref = rest[npl * L + 2]   # out block: (1, BP, OP) f32
    hstate_ref = rest[npl * L + 3]   # out block: (L, BP, HP) f32 (resident)

    t = pl.program_id(0)

    # Seed the resident hidden-state block from the (aliased) input once.
    @pl.when(t == 0)
    def _():
        hstate_ref[...] = h0_ref[...]

    # In-kernel embedding lookup as a one-hot matmul against the layer-0 weight
    # (the embedding table was folded into that weight host-side).
    ids = ids_ref[0]                                           # (BP, 1) int32
    bp = ids.shape[0]
    onehot = (jax.lax.broadcasted_iota(jnp.int32, (bp, VP), 1) == ids)
    x = onehot.astype(jnp.float32).astype(jnp.bfloat16)        # bf16 MXU operand

    for l in range(L):
        h_prev = hstate_ref[l]                                 # (BP, HP) f32
        if stacked:
            # One (BP, K) x (K, 4*HP) dot per layer; column blocks r|z|n_i|n_h.
            w_ref, b_ref, bhn_ref = layer_refs[3 * l: 3 * l + 3]
            xk = jnp.concatenate([x, h_prev.astype(jnp.bfloat16)], axis=-1)
            g = jnp.dot(xk, w_ref[...], preferred_element_type=jnp.float32)
            g = g + b_ref[...]                                 # bias block 3 is zero
            g_r, g_z = g[:, 0:HP], g[:, HP:2 * HP]
            g_ni, g_nh = g[:, 2 * HP:3 * HP], g[:, 3 * HP:4 * HP]
        else:
            # v5e / 128-deep MXU: keep two fused-gate dots (gates r|z|n on lanes).
            wi_ref, wh_ref, bgi_ref, bhn_ref = layer_refs[4 * l: 4 * l + 4]
            gi = jnp.dot(x, wi_ref[...], preferred_element_type=jnp.float32)
            gi = gi + bgi_ref[...]
            gh = jnp.dot(h_prev.astype(jnp.bfloat16), wh_ref[...],
                         preferred_element_type=jnp.float32)
            g_r = gi[:, 0:HP] + gh[:, 0:HP]
            g_z = gi[:, HP:2 * HP] + gh[:, HP:2 * HP]
            g_ni, g_nh = gi[:, 2 * HP:3 * HP], gh[:, 2 * HP:3 * HP]

        # Gate math in f32 (fast path on every generation incl. v5e).
        r = jax.nn.sigmoid(g_r)
        z = jax.nn.sigmoid(g_z)
        n = jnp.tanh(g_ni + r * (g_nh + bhn_ref[...]))
        h_new = (1.0 - z) * n + z * h_prev                     # PyTorch GRU update

        hstate_ref[l] = h_new
        x = h_new.astype(jnp.bfloat16)                         # next layer input

    logits_ref[0] = (jnp.dot(x, fcw_ref[...], preferred_element_type=jnp.float32)
                     + fcb_ref[...])


# ---------------------------------------------------------------------------
# Host-side one-time packing.
# ---------------------------------------------------------------------------
def _pack_stacked(embed, raw_layers, H, HP, V, VP):
    """Per layer: one (K, 4*HP) bf16 weight [r|z|n_i|n_h], (1,4HP) f32 bias, (1,HP) bh_n."""
    layers = []
    for l, (w_ih, w_hh, b_ih, b_hh) in enumerate(raw_layers):
        in_dim = w_ih.shape[1]
        wi = w_ih.reshape(3, H, in_dim)
        wh = w_hh.reshape(3, H, H)
        bi = b_ih.reshape(3, H)
        bh = b_hh.reshape(3, H)
        if l == 0:
            in_rows, n_in = VP, V
            wi_eff = jnp.stack([embed @ wi[g].T for g in range(3)], axis=0)  # (3,V,H)
        else:
            in_rows, n_in = HP, in_dim
            wi_eff = jnp.transpose(wi, (0, 2, 1))                            # (3,H,H)
        wh_t = jnp.transpose(wh, (0, 2, 1))                                  # (3,H,H)

        W = jnp.zeros((in_rows + HP, 4 * HP), jnp.float32)
        for g in range(3):                       # input-side blocks r, z, n_i
            W = W.at[:n_in, g * HP: g * HP + H].set(wi_eff[g])
        W = W.at[in_rows:in_rows + H, 0 * HP: 0 * HP + H].set(wh_t[0])   # r (hidden)
        W = W.at[in_rows:in_rows + H, 1 * HP: 1 * HP + H].set(wh_t[1])   # z (hidden)
        W = W.at[in_rows:in_rows + H, 3 * HP: 3 * HP + H].set(wh_t[2])   # n_h

        bias = jnp.zeros((1, 4 * HP), jnp.float32)
        bias = bias.at[0, 0 * HP: 0 * HP + H].set(bi[0] + bh[0])
        bias = bias.at[0, 1 * HP: 1 * HP + H].set(bi[1] + bh[1])
        bias = bias.at[0, 2 * HP: 2 * HP + H].set(bi[2])     # bh_n stays separate
        bhn = jnp.zeros((1, HP), jnp.float32).at[0, :H].set(bh[2])
        layers.append((W.astype(jnp.bfloat16), bias, bhn))
    return layers


def _pack_twodot(embed, raw_layers, H, HP, V, VP):
    """Per layer: (K_in,3HP) + (HP,3HP) bf16 weights, (1,3HP) f32 bias, (1,HP) bh_n."""
    layers = []
    for l, (w_ih, w_hh, b_ih, b_hh) in enumerate(raw_layers):
        in_dim = w_ih.shape[1]
        wi = w_ih.reshape(3, H, in_dim)
        wh = w_hh.reshape(3, H, H)
        bi = b_ih.reshape(3, H)
        bh = b_hh.reshape(3, H)
        if l == 0:
            rows, n_in = VP, V
            wi_eff = jnp.stack([embed @ wi[g].T for g in range(3)], axis=0)  # (3,V,H)
        else:
            rows, n_in = HP, in_dim
            wi_eff = jnp.transpose(wi, (0, 2, 1))
        wh_t = jnp.transpose(wh, (0, 2, 1))

        WI = jnp.zeros((rows, 3 * HP), jnp.float32)
        WH = jnp.zeros((HP, 3 * HP), jnp.float32)
        for g in range(3):
            WI = WI.at[:n_in, g * HP: g * HP + H].set(wi_eff[g])
            WH = WH.at[:H, g * HP: g * HP + H].set(wh_t[g])

        bgi = jnp.zeros((1, 3 * HP), jnp.float32)
        bgi = bgi.at[0, 0 * HP: 0 * HP + H].set(bi[0] + bh[0])
        bgi = bgi.at[0, 1 * HP: 1 * HP + H].set(bi[1] + bh[1])
        bgi = bgi.at[0, 2 * HP: 2 * HP + H].set(bi[2])
        bhn = jnp.zeros((1, HP), jnp.float32).at[0, :H].set(bh[2])
        layers.append((WI.astype(jnp.bfloat16), WH.astype(jnp.bfloat16), bgi, bhn))
    return layers


def init_params(key, vocab_size, embed_size, hidden_size, num_layers, output_size,
                stacked_k=None):
    """Synthetic params in PyTorch layout + one-time padded/fused/bf16 repack."""
    if stacked_k is None:
        stacked_k = _default_stacked_k()

    keys = jax.random.split(key, 3 + 4 * num_layers)
    k = iter(keys)
    scale = 0.1

    embed = scale * jax.random.normal(next(k), (vocab_size, embed_size), jnp.float32)
    raw_layers = []
    for l in range(num_layers):
        in_dim = embed_size if l == 0 else hidden_size
        w_ih = scale * jax.random.normal(next(k), (3 * hidden_size, in_dim), jnp.float32)
        w_hh = scale * jax.random.normal(next(k), (3 * hidden_size, hidden_size), jnp.float32)
        b_ih = scale * jax.random.normal(next(k), (3 * hidden_size,), jnp.float32)
        b_hh = scale * jax.random.normal(next(k), (3 * hidden_size,), jnp.float32)
        raw_layers.append((w_ih, w_hh, b_ih, b_hh))
    fc_w = scale * jax.random.normal(next(k), (output_size, hidden_size), jnp.float32)
    fc_b = scale * jax.random.normal(next(k), (output_size,), jnp.float32)

    E, H, O, V = embed_size, hidden_size, output_size, vocab_size
    HP, OP = _round_up(H, _LANE), _round_up(O, _LANE)
    # One-hot width: lane-tile aligned when concatenated with h (stacked mode),
    # sublane-aligned weight rows otherwise.
    VP = _round_up(V, _LANE) if stacked_k else _round_up(V, _SUBLANE)

    if stacked_k:
        packed_layers = _pack_stacked(embed, raw_layers, H, HP, V, VP)
    else:
        packed_layers = _pack_twodot(embed, raw_layers, H, HP, V, VP)

    fcw_p = jnp.zeros((HP, OP), jnp.float32).at[:H, :O].set(fc_w.T).astype(jnp.bfloat16)
    fcb_p = jnp.zeros((1, OP), jnp.float32).at[0, :O].set(fc_b)

    return {
        "raw": {"embed": embed, "layers": raw_layers, "fc_w": fc_w, "fc_b": fc_b},
        "packed": {"layers": packed_layers, "fc_w_t": fcw_p, "fc_b": fcb_p},
        "dims": dict(E=E, H=H, O=O, V=V, HP=HP, OP=OP, VP=VP, L=num_layers,
                     stacked=stacked_k),
    }


# ---------------------------------------------------------------------------
# Wrapper / API.
# ---------------------------------------------------------------------------
def make_rnn_forward(params, batch_size):
    packed, d = params["packed"], params["dims"]
    L, H, O = d["L"], d["H"], d["O"]
    HP, OP, VP = d["HP"], d["OP"], d["VP"]
    stacked = d["stacked"]
    B = batch_size
    BP = _round_up(max(B, _SUBLANE), _SUBLANE)

    flat_weights = []
    for layer in packed["layers"]:
        flat_weights += list(layer)
    flat_weights += [packed["fc_w_t"], packed["fc_b"]]
    weight_bytes = sum(int(a.size) * a.dtype.itemsize for a in flat_weights)

    kernel = functools.partial(_gru_decode_kernel, L, HP, VP, stacked)

    def _resident_spec(arr):
        nd = arr.ndim
        return pl.BlockSpec(arr.shape, lambda t: (0,) * nd)   # never re-DMA'd

    def _build_run(T):
        in_specs = [
            pl.BlockSpec((1, BP, 1), lambda t: (t, 0, 0)),     # ids (streamed)
            pl.BlockSpec((L, BP, HP), lambda t: (0, 0, 0)),    # initial hidden
        ] + [_resident_spec(w) for w in flat_weights]
        out_specs = (
            pl.BlockSpec((1, BP, OP), lambda t: (t, 0, 0)),    # logits (streamed)
            pl.BlockSpec((L, BP, HP), lambda t: (0, 0, 0)),    # hidden (resident)
        )

        per_step_flops = 2 * BP * HP * OP
        for l in range(L):
            k_in = VP if l == 0 else HP
            gates = 4 if stacked else 3
            per_step_flops += 2 * BP * (k_in + HP) * gates * HP
        cost = pl.CostEstimate(
            flops=int(T * per_step_flops),
            transcendentals=int(T * L * BP * 3 * HP),
            bytes_accessed=int(weight_bytes + 4 * T * BP
                               + 4 * 2 * L * BP * HP + 4 * T * BP * OP),
        )

        call = pl.pallas_call(
            kernel,
            grid=(T,),
            out_shape=(
                jax.ShapeDtypeStruct((T, BP, OP), jnp.float32),
                jax.ShapeDtypeStruct((L, BP, HP), jnp.float32),
            ),
            in_specs=in_specs,
            out_specs=out_specs,
            input_output_aliases={1: 1},          # hidden updated in place
            compiler_params=pltpu.CompilerParams(
                dimension_semantics=("arbitrary",)),  # state carried across steps
            cost_estimate=cost,
        )

        def run(ids_seq, hidden_p):
            # ids_seq: (T, B) int; hidden_p: padded (L, BP, HP) f32.
            ids_p = jnp.zeros((T, BP, 1), jnp.int32).at[:, :B, 0].set(
                ids_seq.astype(jnp.int32))
            return call(ids_p, hidden_p, *flat_weights)
        return run

    _run_cache = {}

    def _get_run(T):
        if T not in _run_cache:
            _run_cache[T] = _build_run(T)
        return _run_cache[T]

    _jit_cache = {}

    def decode_padded(ids_seq, hidden_p):
        """Teacher-forced T-step decode; weights stay VMEM-resident across steps.

        Note: padded batch rows of the carried hidden accumulate (isolated) junk
        from the token-0 one-hot path; they never mix into real rows and are
        dropped by unpad_hidden().
        """
        T = int(ids_seq.shape[0])
        if T not in _jit_cache:
            _jit_cache[T] = jax.jit(_get_run(T))
        return _jit_cache[T](ids_seq, hidden_p)

    def pad_hidden(hidden):
        return jnp.zeros((L, BP, HP), jnp.float32).at[:, :B, :H].set(
            hidden.astype(jnp.float32))

    def unpad_hidden(hidden_p):
        return hidden_p[:, :B, :H]

    def unpad_logits(logits_p):
        return logits_p[:, :B, :O]

    _run1 = _get_run(1)

    @jax.jit
    def forward(x, hidden):
        """Module-compatible single step (unpadded in/out). Sampling loops should
        prefer decode_padded + pad_hidden to avoid per-step pad/slice launches."""
        hidden_p = jnp.zeros((L, BP, HP), jnp.float32).at[:, :B, :H].set(
            hidden.astype(jnp.float32))
        logits_p, h_new_p = _run1(x[None, :], hidden_p)
        return logits_p[0, :B, :O], h_new_p[:, :B, :H]

    return types.SimpleNamespace(forward=forward, decode_padded=decode_padded,
                                 pad_hidden=pad_hidden, unpad_hidden=unpad_hidden,
                                 unpad_logits=unpad_logits)


# ---------------------------------------------------------------------------
# Pure-JAX reference (matches PyTorch Embedding + GRU + Linear exactly, f32).
# ---------------------------------------------------------------------------
def rnn_forward_ref(params, x, hidden):
    raw = params["raw"]
    out = raw["embed"][x]
    h_new = []
    for (w_ih, w_hh, b_ih, b_hh), h_prev in zip(raw["layers"], hidden):
        wir, wiz, win = jnp.split(w_ih, 3, axis=0)
        whr, whz, whn = jnp.split(w_hh, 3, axis=0)
        bir, biz, bin_ = jnp.split(b_ih, 3)
        bhr, bhz, bhn = jnp.split(b_hh, 3)
        r = jax.nn.sigmoid(out @ wir.T + bir + h_prev @ whr.T + bhr)
        z = jax.nn.sigmoid(out @ wiz.T + biz + h_prev @ whz.T + bhz)
        n = jnp.tanh(out @ win.T + bin_ + r * (h_prev @ whn.T + bhn))
        out = (1.0 - z) * n + z * h_prev
        h_new.append(out)
    logits = out @ raw["fc_w"].T + raw["fc_b"]
    return logits, jnp.stack(h_new, axis=0)


if __name__ == "__main__":
    vocab_size = 48          # input_size == output_size (vocabulary)
    embed_size = 30
    hidden_size = 32
    num_layers = 2
    batch = 2

    key = jax.random.PRNGKey(0)
    pkey, xkey, skey = jax.random.split(key, 3)
    params = init_params(pkey, vocab_size, embed_size, hidden_size, num_layers,
                         vocab_size)
    rnn = make_rnn_forward(params, batch)

    x = jax.random.randint(xkey, (batch,), 0, vocab_size, dtype=jnp.int32)
    hidden0 = jnp.zeros((num_layers, batch, hidden_size), jnp.float32)  # init_hidden()

    # bf16 matmul operands -> loosened tolerances vs the f32 reference.
    ATOL, RTOL = 2e-2, 2e-2

    # ---- module-compatible per-step forward (T == 1) ----
    logits1, h1 = rnn.forward(x, hidden0)
    logits2, h2 = rnn.forward(x, h1)
    logits1, h1, logits2, h2 = jax.block_until_ready((logits1, h1, logits2, h2))

    ref_logits1, ref_h1 = rnn_forward_ref(params, x, hidden0)
    ref_logits2, ref_h2 = rnn_forward_ref(params, x, ref_h1)

    assert logits1.shape == (batch, vocab_size)
    assert h1.shape == (num_layers, batch, hidden_size)
    assert jnp.allclose(logits1, ref_logits1, atol=ATOL, rtol=RTOL)
    assert jnp.allclose(h1, ref_h1, atol=ATOL, rtol=RTOL)
    assert jnp.allclose(logits2, ref_logits2, atol=ATOL, rtol=RTOL)
    assert jnp.allclose(h2, ref_h2, atol=ATOL, rtol=RTOL)

    # ---- fused T-step teacher-forced decode (weights VMEM-resident across steps) ----
    T = 4
    ids_seq = jax.random.randint(skey, (T, batch), 0, vocab_size, dtype=jnp.int32)
    hp0 = rnn.pad_hidden(hidden0)
    logits_seq_p, hpT = rnn.decode_padded(ids_seq, hp0)
    logits_seq = rnn.unpad_logits(logits_seq_p)
    h_T = rnn.unpad_hidden(hpT)
    logits_seq, h_T = jax.block_until_ready((logits_seq, h_T))

    h_ref = hidden0
    ref_steps = []
    for t in range(T):
        lg, h_ref = rnn_forward_ref(params, ids_seq[t], h_ref)
        ref_steps.append(lg)
    ref_seq = jnp.stack(ref_steps, axis=0)

    assert logits_seq.shape == (T, batch, vocab_size)
    assert jnp.allclose(logits_seq, ref_seq, atol=ATOL, rtol=RTOL)
    assert jnp.allclose(h_T, h_ref, atol=ATOL, rtol=RTOL)

    print("KERNEL_OK")
</pallas_src>

<mosaic_0001>
module attributes {stable_mosaic.version = 11 : i64} {
  func.func @_gru_decode_kernel(%arg0: i32, %arg1: memref<1x8x1xi32, #tpu.memory_space<vmem>>, %arg2: memref<2x8x128xf32, #tpu.memory_space<vmem>>, %arg3: memref<256x512xbf16, #tpu.memory_space<vmem>>, %arg4: memref<1x512xf32, #tpu.memory_space<vmem>>, %arg5: memref<1x128xf32, #tpu.memory_space<vmem>>, %arg6: memref<256x512xbf16, #tpu.memory_space<vmem>>, %arg7: memref<1x512xf32, #tpu.memory_space<vmem>>, %arg8: memref<1x128xf32, #tpu.memory_space<vmem>>, %arg9: memref<128x128xbf16, #tpu.memory_space<vmem>>, %arg10: memref<1x128xf32, #tpu.memory_space<vmem>>, %arg11: memref<1x8x128xf32, #tpu.memory_space<vmem>>, %arg12: memref<2x8x128xf32, #tpu.memory_space<vmem>>) attributes {dimension_semantics = [#tpu.dimension_semantics<arbitrary>], iteration_bounds = array<i64: 1>, scalar_prefetch = 0 : i64, scratch_operands = 0 : i64, tpu.core_type = #tpu.core_type<tc>, window_params = [{transform_indices = @transform_0, window_bounds = array<i64: 1, 8, 1>}, {pipeline_mode = #tpu.pipeline_mode<synchronous>, transform_indices = @transform_1, window_bounds = array<i64: 2, 8, 128>}, {pipeline_mode = #tpu.pipeline_mode<synchronous>, transform_indices = @transform_2, window_bounds = array<i64: 256, 512>}, {pipeline_mode = #tpu.pipeline_mode<synchronous>, transform_indices = @transform_3, window_bounds = array<i64: 1, 512>}, {pipeline_mode = #tpu.pipeline_mode<synchronous>, transform_indices = @transform_4, window_bounds = array<i64: 1, 128>}, {pipeline_mode = #tpu.pipeline_mode<synchronous>, transform_indices = @transform_5, window_bounds = array<i64: 256, 512>}, {pipeline_mode = #tpu.pipeline_mode<synchronous>, transform_indices = @transform_6, window_bounds = array<i64: 1, 512>}, {pipeline_mode = #tpu.pipeline_mode<synchronous>, transform_indices = @transform_7, window_bounds = array<i64: 1, 128>}, {pipeline_mode = #tpu.pipeline_mode<synchronous>, transform_indices = @transform_8, window_bounds = array<i64: 128, 128>}, {pipeline_mode = #tpu.pipeline_mode<synchronous>, transform_indices = @transform_9, window_bounds = array<i64: 1, 128>}, {transform_indices = @transform_10, window_bounds = array<i64: 1, 8, 128>}, {pipeline_mode = #tpu.pipeline_mode<synchronous>, transform_indices = @transform_11, window_bounds = array<i64: 2, 8, 128>}]} {
    %c0_i32 = arith.constant 0 : i32
    %0 = arith.cmpi eq, %arg0, %c0_i32 : i32
    %1 = arith.extui %0 : i1 to i32
    %c0_i32_0 = arith.constant 0 : i32
    %2 = arith.cmpi ne, %1, %c0_i32_0 : i32
    scf.if %2 {
      %c0_41 = arith.constant 0 : index
      %c0_42 = arith.constant 0 : index
      %c0_43 = arith.constant 0 : index
      %95 = vector.load %arg2[%c0_41, %c0_42, %c0_43] : memref<2x8x128xf32, #tpu.memory_space<vmem>>, vector<2x8x128xf32>
      %c0_44 = arith.constant 0 : index
      %c0_45 = arith.constant 0 : index
      %c0_46 = arith.constant 0 : index
      %96 = vector.load %arg12[%c0_44, %c0_45, %c0_46] : memref<2x8x128xf32, #tpu.memory_space<vmem>>, vector<2x8x128xf32>
      tpu.vector_store %arg12[%c0_44, %c0_45, %c0_46], %95 {strides = array<i32>} : memref<2x8x128xf32, #tpu.memory_space<vmem>>, vector<2x8x128xf32>,
    } else {
    }
    %c0 = arith.constant 0 : index
    %c0_1 = arith.constant 0 : index
    %c0_2 = arith.constant 0 : index
    %3 = vector.load %arg1[%c0, %c0_1, %c0_2] : memref<1x8x1xi32, #tpu.memory_space<vmem>>, vector<1x8x1xi32>
    %4 = vector.shape_cast %3 : vector<1x8x1xi32> to vector<8x1xi32>
    %5 = tpu.iota {dimensions = array<i32: 1>} : vector<8x128xi32>
    %6 = vector.broadcast %4 : vector<8x1xi32> to vector<8x128xi32>
    %7 = arith.cmpi eq, %5, %6 : vector<8x128xi32>
    %8 = arith.extui %7 : vector<8x128xi1> to vector<8x128xi32>
    %9 = arith.sitofp %8 : vector<8x128xi32> to vector<8x128xf32>
    %10 = arith.truncf %9 : vector<8x128xf32> to vector<8x128xbf16>
    %c0_3 = arith.constant 0 : index
    %c0_4 = arith.constant 0 : index
    %c0_5 = arith.constant 0 : index
    %11 = vector.load %arg12[%c0_3, %c0_4, %c0_5] : memref<2x8x128xf32, #tpu.memory_space<vmem>>, vector<1x8x128xf32>
    %12 = vector.shape_cast %11 : vector<1x8x128xf32> to vector<8x128xf32>
    %13 = arith.truncf %12 : vector<8x128xf32> to vector<8x128xbf16>
    %14 = tpu.concatenate %10, %13 in 1 : vector<8x128xbf16>, vector<8x128xbf16> -> vector<8x256xbf16>
    %c0_6 = arith.constant 0 : index
    %c0_7 = arith.constant 0 : index
    %15 = vector.load %arg3[%c0_6, %c0_7] : memref<256x512xbf16, #tpu.memory_space<vmem>>, vector<256x512xbf16>
    %cst = arith.constant dense<0.000000e+00> : vector<8x512xf32>
    %16 = tpu.matmul %14, %15, %cst {dimension_numbers = #tpu.dot_dimension_numbers<[1], [0], [0], [1], [0, 0, 1, 1], [], []>} : vector<8x256xbf16>, vector<256x512xbf16>, vector<8x512xf32> -> vector<8x512xf32>
    %c0_8 = arith.constant 0 : index
    %c0_9 = arith.constant 0 : index
    %17 = vector.load %arg4[%c0_8, %c0_9] : memref<1x512xf32, #tpu.memory_space<vmem>>, vector<1x512xf32>
    %18 = vector.broadcast %17 : vector<1x512xf32> to vector<8x512xf32>
    %19 = arith.addf %16, %18 : vector<8x512xf32>
    %20 = vector.extract_strided_slice %19 {offsets = [0, 0], sizes = [8, 128], strides = [1, 1]} : vector<8x512xf32> to vector<8x128xf32>
    %21 = vector.extract_strided_slice %19 {offsets = [0, 128], sizes = [8, 128], strides = [1, 1]} : vector<8x512xf32> to vector<8x128xf32>
    %22 = vector.extract_strided_slice %19 {offsets = [0, 256], sizes = [8, 128], strides = [1, 1]} : vector<8x512xf32> to vector<8x128xf32>
    %23 = vector.extract_strided_slice %19 {offsets = [0, 384], sizes = [8, 128], strides = [1, 1]} : vector<8x512xf32> to vector<8x128xf32>
    %24 = arith.negf %20 : vector<8x128xf32>
    %25 = math.exp %24 : vector<8x128xf32>
    %cst_10 = arith.constant 1.000000e+00 : f32
    %26 = vector.broadcast %cst_10 : f32 to vector<8x128xf32>
    %27 = arith.addf %26, %25 : vector<8x128xf32>
    %28 = arith.divf %26, %27 : vector<8x128xf32>
    %29 = arith.negf %21 : vector<8x128xf32>
    %30 = math.exp %29 : vector<8x128xf32>
    %cst_11 = arith.constant 1.000000e+00 : f32
    %31 = vector.broadcast %cst_11 : f32 to vector<8x128xf32>
    %32 = arith.addf %31, %30 : vector<8x128xf32>
    %33 = arith.divf %31, %32 : vector<8x128xf32>
    %c0_12 = arith.constant 0 : index
    %c0_13 = arith.constant 0 : index
    %34 = vector.load %arg5[%c0_12, %c0_13] : memref<1x128xf32, #tpu.memory_space<vmem>>, vector<1x128xf32>
    %35 = vector.broadcast %34 : vector<1x128xf32> to vector<8x128xf32>
    %36 = arith.addf %23, %35 : vector<8x128xf32>
    %37 = arith.mulf %28, %36 : vector<8x128xf32>
    %38 = arith.addf %22, %37 : vector<8x128xf32>
    %39 = math.tanh %38 : vector<8x128xf32>
    %cst_14 = arith.constant 1.000000e+00 : f32
    %40 = vector.broadcast %cst_14 : f32 to vector<8x128xf32>
    %41 = arith.subf %40, %33 : vector<8x128xf32>
    %42 = arith.mulf %41, %39 : vector<8x128xf32>
    %43 = arith.mulf %33, %12 : vector<8x128xf32>
    %44 = arith.addf %42, %43 : vector<8x128xf32>
    %c0_15 = arith.constant 0 : index
    %c0_16 = arith.constant 0 : index
    %c0_17 = arith.constant 0 : index
    %45 = vector.load %arg12[%c0_15, %c0_16, %c0_17] : memref<2x8x128xf32, #tpu.memory_space<vmem>>, vector<1x8x128xf32>
    %46 = vector.shape_cast %45 : vector<1x8x128xf32> to vector<8x128xf32>
    %47 = vector.shape_cast %44 : vector<8x128xf32> to vector<1x8x128xf32>
    tpu.vector_store %arg12[%c0_15, %c0_16, %c0_17], %47 {strides = array<i32>} : memref<2x8x128xf32, #tpu.memory_space<vmem>>, vector<1x8x128xf32>,
    %48 = arith.truncf %44 : vector<8x128xf32> to vector<8x128xbf16>
    %c1 = arith.constant 1 : index
    %c0_18 = arith.constant 0 : index
    %c0_19 = arith.constant 0 : index
    %49 = vector.load %arg12[%c1, %c0_18, %c0_19] : memref<2x8x128xf32, #tpu.memory_space<vmem>>, vector<1x8x128xf32>
    %50 = vector.shape_cast %49 : vector<1x8x128xf32> to vector<8x128xf32>
    %51 = arith.truncf %50 : vector<8x128xf32> to vector<8x128xbf16>
    %52 = tpu.concatenate %48, %51 in 1 : vector<8x128xbf16>, vector<8x128xbf16> -> vector<8x256xbf16>
    %c0_20 = arith.constant 0 : index
    %c0_21 = arith.constant 0 : index
    %53 = vector.load %arg6[%c0_20, %c0_21] : memref<256x512xbf16, #tpu.memory_space<vmem>>, vector<256x512xbf16>
    %cst_22 = arith.constant dense<0.000000e+00> : vector<8x512xf32>
    %54 = tpu.matmul %52, %53, %cst_22 {dimension_numbers = #tpu.dot_dimension_numbers<[1], [0], [0], [1], [0, 0, 1, 1], [], []>} : vector<8x256xbf16>, vector<256x512xbf16>, vector<8x512xf32> -> vector<8x512xf32>
    %c0_23 = arith.constant 0 : index
    %c0_24 = arith.constant 0 : index
    %55 = vector.load %arg7[%c0_23, %c0_24] : memref<1x512xf32, #tpu.memory_space<vmem>>, vector<1x512xf32>
    %56 = vector.broadcast %55 : vector<1x512xf32> to vector<8x512xf32>
    %57 = arith.addf %54, %56 : vector<8x512xf32>
    %58 = vector.extract_strided_slice %57 {offsets = [0, 0], sizes = [8, 128], strides = [1, 1]} : vector<8x512xf32> to vector<8x128xf32>
    %59 = vector.extract_strided_slice %57 {offsets = [0, 128], sizes = [8, 128], strides = [1, 1]} : vector<8x512xf32> to vector<8x128xf32>
    %60 = vector.extract_strided_slice %57 {offsets = [0, 256], sizes = [8, 128], strides = [1, 1]} : vector<8x512xf32> to vector<8x128xf32>
    %61 = vector.extract_strided_slice %57 {offsets = [0, 384], sizes = [8, 128], strides = [1, 1]} : vector<8x512xf32> to vector<8x128xf32>
    %62 = arith.negf %58 : vector<8x128xf32>
    %63 = math.exp %62 : vector<8x128xf32>
    %cst_25 = arith.constant 1.000000e+00 : f32
    %64 = vector.broadcast %cst_25 : f32 to vector<8x128xf32>
    %65 = arith.addf %64, %63 : vector<8x128xf32>
    %66 = arith.divf %64, %65 : vector<8x128xf32>
    %67 = arith.negf %59 : vector<8x128xf32>
    %68 = math.exp %67 : vector<8x128xf32>
    %cst_26 = arith.constant 1.000000e+00 : f32
    %69 = vector.broadcast %cst_26 : f32 to vector<8x128xf32>
    %70 = arith.addf %69, %68 : vector<8x128xf32>
    %71 = arith.divf %69, %70 : vector<8x128xf32>
    %c0_27 = arith.constant 0 : index
    %c0_28 = arith.constant 0 : index
    %72 = vector.load %arg8[%c0_27, %c0_28] : memref<1x128xf32, #tpu.memory_space<vmem>>, vector<1x128xf32>
    %73 = vector.broadcast %72 : vector<1x128xf32> to vector<8x128xf32>
    %74 = arith.addf %61, %73 : vector<8x128xf32>
    %75 = arith.mulf %66, %74 : vector<8x128xf32>
    %76 = arith.addf %60, %75 : vector<8x128xf32>
    %77 = math.tanh %76 : vector<8x128xf32>
    %cst_29 = arith.constant 1.000000e+00 : f32
    %78 = vector.broadcast %cst_29 : f32 to vector<8x128xf32>
    %79 = arith.subf %78, %71 : vector<8x128xf32>
    %80 = arith.mulf %79, %77 : vector<8x128xf32>
    %81 = arith.mulf %71, %50 : vector<8x128xf32>
    %82 = arith.addf %80, %81 : vector<8x128xf32>
    %c1_30 = arith.constant 1 : index
    %c0_31 = arith.constant 0 : index
    %c0_32 = arith.constant 0 : index
    %83 = vector.load %arg12[%c1_30, %c0_31, %c0_32] : memref<2x8x128xf32, #tpu.memory_space<vmem>>, vector<1x8x128xf32>
    %84 = vector.shape_cast %83 : vector<1x8x128xf32> to vector<8x128xf32>
    %85 = vector.shape_cast %82 : vector<8x128xf32> to vector<1x8x128xf32>
    tpu.vector_store %arg12[%c1_30, %c0_31, %c0_32], %85 {strides = array<i32>} : memref<2x8x128xf32, #tpu.memory_space<vmem>>, vector<1x8x128xf32>,
    %86 = arith.truncf %82 : vector<8x128xf32> to vector<8x128xbf16>
    %c0_33 = arith.constant 0 : index
    %c0_34 = arith.constant 0 : index
    %87 = vector.load %arg9[%c0_33, %c0_34] : memref<128x128xbf16, #tpu.memory_space<vmem>>, vector<128x128xbf16>
    %cst_35 = arith.constant dense<0.000000e+00> : vector<8x128xf32>
    %88 = tpu.matmul %86, %87, %cst_35 {dimension_numbers = #tpu.dot_dimension_numbers<[1], [0], [0], [1], [0, 0, 1, 1], [], []>} : vector<8x128xbf16>, vector<128x128xbf16>, vector<8x128xf32> -> vector<8x128xf32>
    %c0_36 = arith.constant 0 : index
    %c0_37 = arith.constant 0 : index
    %89 = vector.load %arg10[%c0_36, %c0_37] : memref<1x128xf32, #tpu.memory_space<vmem>>, vector<1x128xf32>
    %90 = vector.broadcast %89 : vector<1x128xf32> to vector<8x128xf32>
    %91 = arith.addf %88, %90 : vector<8x128xf32>
    %c0_38 = arith.constant 0 : index
    %c0_39 = arith.constant 0 : index
    %c0_40 = arith.constant 0 : index
    %92 = vector.load %arg11[%c0_38, %c0_39, %c0_40] : memref<1x8x128xf32, #tpu.memory_space<vmem>>, vector<1x8x128xf32>
    %93 = vector.shape_cast %92 : vector<1x8x128xf32> to vector<8x128xf32>
    %94 = vector.shape_cast %91 : vector<8x128xf32> to vector<1x8x128xf32>
    tpu.vector_store %arg11[%c0_38, %c0_39, %c0_40], %94 {strides = array<i32>} : memref<1x8x128xf32, #tpu.memory_space<vmem>>, vector<1x8x128xf32>,
    return
  }
  func.func @transform_0(%arg0: i32) -> (i32, i32, i32) {
    %c0_i32 = arith.constant 0 : i32
    %c0_i32_0 = arith.constant 0 : i32
    %c0_i32_1 = arith.constant 0 : i32
    return %arg0, %c0_i32, %c0_i32_0 : i32, i32, i32
  }
  func.func @transform_1(%arg0: i32) -> (i32, i32, i32) {
    %c0_i32 = arith.constant 0 : i32
    %c0_i32_0 = arith.constant 0 : i32
    %c0_i32_1 = arith.constant 0 : i32
    %c0_i32_2 = arith.constant 0 : i32
    return %c0_i32, %c0_i32_0, %c0_i32_1 : i32, i32, i32
  }
  func.func @transform_2(%arg0: i32) -> (i32, i32) {
    %c0_i32 = arith.constant 0 : i32
    %c0_i32_0 = arith.constant 0 : i32
    %c0_i32_1 = arith.constant 0 : i32
    return %c0_i32, %c0_i32_0 : i32, i32
  }
  func.func @transform_3(%arg0: i32) -> (i32, i32) {
    %c0_i32 = arith.constant 0 : i32
    %c0_i32_0 = arith.constant 0 : i32
    %c0_i32_1 = arith.constant 0 : i32
    return %c0_i32, %c0_i32_0 : i32, i32
  }
  func.func @transform_4(%arg0: i32) -> (i32, i32) {
    %c0_i32 = arith.constant 0 : i32
    %c0_i32_0 = arith.constant 0 : i32
    %c0_i32_1 = arith.constant 0 : i32
    return %c0_i32, %c0_i32_0 : i32, i32
  }
  func.func @transform_5(%arg0: i32) -> (i32, i32) {
    %c0_i32 = arith.constant 0 : i32
    %c0_i32_0 = arith.constant 0 : i32
    %c0_i32_1 = arith.constant 0 : i32
    return %c0_i32, %c0_i32_0 : i32, i32
  }
  func.func @transform_6(%arg0: i32) -> (i32, i32) {
    %c0_i32 = arith.constant 0 : i32
    %c0_i32_0 = arith.constant 0 : i32
    %c0_i32_1 = arith.constant 0 : i32
    return %c0_i32, %c0_i32_0 : i32, i32
  }
  func.func @transform_7(%arg0: i32) -> (i32, i32) {
    %c0_i32 = arith.constant 0 : i32
    %c0_i32_0 = arith.constant 0 : i32
    %c0_i32_1 = arith.constant 0 : i32
    return %c0_i32, %c0_i32_0 : i32, i32
  }
  func.func @transform_8(%arg0: i32) -> (i32, i32) {
    %c0_i32 = arith.constant 0 : i32
    %c0_i32_0 = arith.constant 0 : i32
    %c0_i32_1 = arith.constant 0 : i32
    return %c0_i32, %c0_i32_0 : i32, i32
  }
  func.func @transform_9(%arg0: i32) -> (i32, i32) {
    %c0_i32 = arith.constant 0 : i32
    %c0_i32_0 = arith.constant 0 : i32
    %c0_i32_1 = arith.constant 0 : i32
    return %c0_i32, %c0_i32_0 : i32, i32
  }
  func.func @transform_10(%arg0: i32) -> (i32, i32, i32) {
    %c0_i32 = arith.constant 0 : i32
    %c0_i32_0 = arith.constant 0 : i32
    %c0_i32_1 = arith.constant 0 : i32
    return %arg0, %c0_i32, %c0_i32_0 : i32, i32, i32
  }
  func.func @transform_11(%arg0: i32) -> (i32, i32, i32) {
    %c0_i32 = arith.constant 0 : i32
    %c0_i32_0 = arith.constant 0 : i32
    %c0_i32_1 = arith.constant 0 : i32
    %c0_i32_2 = arith.constant 0 : i32
    return %c0_i32, %c0_i32_0, %c0_i32_1 : i32, i32, i32
  }
}

</mosaic_0001>

<bundles_post_ra>
// kernel: forward.1
= control target key start
LH: loop header
LB: loop body
LE: loop exit
PB: predicated region body
PF: predicated region fallthrough
CT: control target
= control target key end

     0   :  { %17 = vsyncpa [#allocation3], 0  ;;  %s2283_s0 = inlined_call_operand.vmem [shape: s32[1,8,1], index: 0, kind: input, shape index: {}]   ;;  %s2284_s1 = inlined_call_operand.vmem [shape: f32[2,8,128], index: 1, kind: input, shape index: {}, may-alias: {1,11}]   ;;  %s2285_s2 = inlined_call_operand.hbm [shape: bf16[256,512], index: 2, kind: input, shape index: {}]   ;;  %s2286_s3 = inlined_call_operand.vmem [shape: f32[1,512], index: 3, kind: input, shape index: {}]   ;;  %s2287_s4 = inlined_call_operand.vmem [shape: f32[1,128], index: 4, kind: input, shape index: {}]   ;;  %s2288_s5 = inlined_call_operand.hbm [shape: bf16[256,512], index: 5, kind: input, shape index: {}]   ;;  %s2289_s6 = inlined_call_operand.vmem [shape: f32[1,512], index: 6, kind: input, shape index: {}]   ;;  %s2290_s7 = inlined_call_operand.vmem [shape: f32[1,128], index: 7, kind: input, shape index: {}]   ;;  %s2291_s8 = inlined_call_operand.hbm [shape: bf16[128,128], index: 8, kind: input, shape index: {}]   ;;  %s2292_s9 = inlined_call_operand.vmem [shape: f32[1,128], index: 9, kind: input, shape index: {}]   ;;  %s2293_s10 = inlined_call_operand.vmem [shape: f32[1,8,128], index: 10, kind: output, shape index: {0}]   ;;  %s2294_s11 = inlined_call_operand.vmem [shape: f32[2,8,128], index: 11, kind: output, shape index: {1}, may-alias: {1,11}]  }
   0x1   :  { %18 = vsyncpa [#allocation5], 0  ;;  %s44_s19 = sshll.u32 %s2288_s5, 4  ;;  %s2103_s20 = smov [#allocation4]   ;;  %s45_s19 = int_to_ptr.hbm [resolvable:$true] %s44_s19 }
   0x2   :  { %s46_s21 = sshll.u32 %s2103_s20, 4  ;;  %s27_s24 = sshll.u32 %s2285_s2, 4  ;;  %s47_s21 = int_to_ptr.vmem [resolvable:$true] %s46_s21  ;;  %s28_s24 = int_to_ptr.hbm [resolvable:$true] %s27_s24 }
   0x3   :  { %s2104_s25 = smov 256   ;;  %s2105_s26 = smov 16  }
   0x4   :  { %52 = dma.hbm_to_vmem [thread:$0]  %s45_s19, 8192, %s47_s21, [#allocation5], %s2104_s25, %s2104_s25, %s2105_s26  }
   0x5   :  { %s2106_s27 = smov [#allocation2]   ;;  %s61_s12 = sshll.u32 %s2291_s8, 4  ;;  %s62_s12 = int_to_ptr.hbm [resolvable:$true] %s61_s12 }
   0x6   :  { %s29_s28 = sshll.u32 %s2106_s27, 4  ;;  %s2107_s5 = smov [#allocation6]   ;;  %s30_s28 = int_to_ptr.vmem [resolvable:$true] %s29_s28 }
   0x7   :  { %35 = dma.hbm_to_vmem [thread:$0]  %s28_s24, 8192, %s30_s28, [#allocation3], %s2104_s25, %s2104_s25, %s2105_s26  }
   0x8   :  { %s63_s13 = sshll.u32 %s2107_s5, 4  ;;  %s2108_s14 = smov 64   ;;  %s64_s13 = int_to_ptr.vmem [resolvable:$true] %s63_s13 }
   0x9   :  { %s2109_s15 = smov 4  }
   0xa   :  { %69 = dma.hbm_to_vmem [thread:$0]  %s62_s12, 1024, %s64_s13, [#allocation5], %s2108_s14, %s2108_s14, %s2109_s15  }
   0xb   :  { %2099 = dma.done.wait [#allocation3], 8192  }
   0xc   :  { %2100 = vsyncadd [#allocation3], 4294959104 }
   0xd   :  { %2101 = dma.done.wait [#allocation5], 9216  }
   0xe   :  { %2102 = vsyncadd [#allocation5], 4294958080  ;;  %v2110_v0 = vmov 0   ;;  %v92_v1 = vld [vmem:[%s2283_s0] sm:$0xff]  ;;  %v1544_v3 = vld [vmem:[#allocation2 + $0x1f0] sm:$0xf0] }
   0xf   :  { %2003 = vset.pattern.permute.xlu0 %v2110_v0  ;;  %v1918_v2 = vld [vmem:[#allocation2 + $0x1e4] sm:$0xf]  ;;  %v1414_v5 = vld [vmem:[#allocation2 + $0xe0] sm:$0xf]  ;;  %v1888_v6 = vld [vmem:[#allocation2 + $0xec] sm:$0xf0] }
  0x10   :  { %96 = vperm.xlu0 %2003, %v92_v1   ;;  %v1547_v4 = vor.u32 %v1918_v2, %v1544_v3  ;;  %v1886_v7 = vld [vmem:[#allocation2 + $0xe4] sm:$0xf]  ;;  %v1415_v8 = vor.u32 %v1888_v6, %v1414_v5  ;;  %v1416_v9 = vld [vmem:[#allocation2 + $0xf0] sm:$0xf0]  ;;  %v1542_v10 = vld [vmem:[#allocation2 + $0x1e0] sm:$0xf] }
  0x11   :  { %v1920_v11 = vld [vmem:[#allocation2 + $0x1ec] sm:$0xf0]  ;;  %v1419_v12 = vor.u32 %v1886_v7, %v1416_v9  ;;  %v1914_v14 = vld [vmem:[#allocation2 + $0x1c4] sm:$0xf]  ;;  %v1528_v15 = vld [vmem:[#allocation2 + $0x1d0] sm:$0xf0] }
  0x12   :  { %537 = vmatpush.bf16.msra.mxu3 %v1547_v4  ;;  %v1543_v13 = vor.u32 %v1920_v11, %v1542_v10  ;;  %v1398_v16 = vld [vmem:[#allocation2 + $0xc0] sm:$0xf]  ;;  %498 = vmatpush.bf16.msra.mxu0 %v1415_v8  ;;  %v1531_v17 = vor.u32 %v1914_v14, %v1528_v15  ;;  %v1884_v18 = vld [vmem:[#allocation2 + $0xcc] sm:$0xf0]  ;;  %v1882_v19 = vld [vmem:[#allocation2 + $0xc4] sm:$0xf] }
  0x13   :  { %v1400_v20 = vld [vmem:[#allocation2 + $0xd0] sm:$0xf0]  ;;  %524 = vmatpush.bf16.msra.mxu2 %v1419_v12  ;;  %v1399_v21 = vor.u32 %v1884_v18, %v1398_v16  ;;  %v1526_v23 = vld [vmem:[#allocation2 + $0x1c0] sm:$0xf]  ;;  %v1916_v24 = vld [vmem:[#allocation2 + $0x1cc] sm:$0xf0] }
  0x14   :  { %511 = vmatpush.bf16.msra.mxu1 %v1543_v13  ;;  %v1403_v22 = vor.u32 %v1882_v19, %v1400_v20  ;;  %v1910_v25 = vld [vmem:[#allocation2 + $0x1a4] sm:$0xf]  ;;  %v1527_v26 = vor.u32 %v1916_v24, %v1526_v23  ;;  %v1512_v27 = vld [vmem:[#allocation2 + $0x1b0] sm:$0xf0]  ;;  %v1382_v28 = vld [vmem:[#allocation2 + $0xa0] sm:$0xf] }
  0x15   :  { %v1880_v29 = vld [vmem:[#allocation2 + $0xac] sm:$0xf0]  ;;  %v1515_v30 = vor.u32 %v1910_v25, %v1512_v27  ;;  %v1878_v31 = vld [vmem:[#allocation2 + $0xa4] sm:$0xf]  ;;  %v1384_v32 = vld [vmem:[#allocation2 + $0xb0] sm:$0xf0] }
  0x16   :  { %538 = vmatpush.bf16.msra.mxu3 %v1531_v17  ;;  %v1510_v33 = vld [vmem:[#allocation2 + $0x1a0] sm:$0xf]  ;;  %499 = vmatpush.bf16.msra.mxu0 %v1399_v21  ;;  %v1383_v34 = vor.u32 %v1880_v29, %v1382_v28  ;;  %v1912_v35 = vld [vmem:[#allocation2 + $0x1ac] sm:$0xf0]  ;;  %v1906_v36 = vld [vmem:[#allocation2 + $0x184] sm:$0xf]  ;;  %v1387_v38 = vor.u32 %v1878_v31, %v1384_v32 }
  0x17   :  { %v1496_v37 = vld [vmem:[#allocation2 + $0x190] sm:$0xf0]  ;;  %525 = vmatpush.bf16.msra.mxu2 %v1403_v22  ;;  %v1511_v39 = vor.u32 %v1912_v35, %v1510_v33  ;;  %v1366_v40 = vld [vmem:[#allocation2 + $0x80] sm:$0xf]  ;;  %v1876_v41 = vld [vmem:[#allocation2 + $0x8c] sm:$0xf0] }
  0x18   :  { %512 = vmatpush.bf16.msra.mxu1 %v1527_v26  ;;  %v1874_v42 = vld [vmem:[#allocation2 + $0x84] sm:$0xf]  ;;  %v1368_v43 = vld [vmem:[#allocation2 + $0x90] sm:$0xf0]  ;;  %v1494_v44 = vld [vmem:[#allocation2 + $0x180] sm:$0xf]  ;;  %v1499_v46 = vor.u32 %v1906_v36, %v1496_v37  ;;  %v1367_v47 = vor.u32 %v1876_v41, %v1366_v40 }
  0x19   :  { %v1908_v45 = vld [vmem:[#allocation2 + $0x18c] sm:$0xf0]  ;;  %v1902_v48 = vld [vmem:[#allocation2 + $0x164] sm:$0xf]  ;;  %v1480_v49 = vld [vmem:[#allocation2 + $0x170] sm:$0xf0]  ;;  %v1371_v50 = vor.u32 %v1874_v42, %v1368_v43 }
  0x1a   :  { %539 = vmatpush.bf16.msra.mxu3 %v1515_v30  ;;  %500 = vmatpush.bf16.msra.mxu0 %v1383_v34  ;;  %v1495_v51 = vor.u32 %v1908_v45, %v1494_v44  ;;  %v1350_v52 = vld [vmem:[#allocation2 + $0x60] sm:$0xf]  ;;  %v1872_v53 = vld [vmem:[#allocation2 + $0x6c] sm:$0xf0]  ;;  %v1870_v54 = vld [vmem:[#allocation2 + $0x64] sm:$0xf]  ;;  %v1483_v58 = vor.u32 %v1902_v48, %v1480_v49 }
  0x1b   :  { %526 = vmatpush.bf16.msra.mxu2 %v1387_v38  ;;  %v1352_v55 = vld [vmem:[#allocation2 + $0x70] sm:$0xf0]  ;;  %v1478_v56 = vld [vmem:[#allocation2 + $0x160] sm:$0xf]  ;;  %v1904_v57 = vld [vmem:[#allocation2 + $0x16c] sm:$0xf0]  ;;  %v1351_v59 = vor.u32 %v1872_v53, %v1350_v52 }
  0x1c   :  { %513 = vmatpush.bf16.msra.mxu1 %v1511_v39  ;;  %v1898_v60 = vld [vmem:[#allocation2 + $0x144] sm:$0xf]  ;;  %v1464_v61 = vld [vmem:[#allocation2 + $0x150] sm:$0xf0]  ;;  %v1355_v62 = vor.u32 %v1870_v54, %v1352_v55  ;;  %v1479_v63 = vor.u32 %v1904_v57, %v1478_v56  ;;  %v1334_v0 = vld [vmem:[#allocation2 + $0x40] sm:$0xf] }
  0x1d   :  { %v1868_v1 = vld [vmem:[#allocation2 + $0x4c] sm:$0xf0]  ;;  %v1866_v2 = vld [vmem:[#allocation2 + $0x44] sm:$0xf]  ;;  %v1336_v3 = vld [vmem:[#allocation2 + $0x50] sm:$0xf0]  ;;  %v1467_v6 = vor.u32 %v1898_v60, %v1464_v61 }
  0x1e   :  { %540 = vmatpush.bf16.msra.mxu3 %v1499_v46  ;;  %501 = vmatpush.bf16.msra.mxu0 %v1367_v47  ;;  %v1462_v4 = vld [vmem:[#allocation2 + $0x140] sm:$0xf]  ;;  %v1900_v5 = vld [vmem:[#allocation2 + $0x14c] sm:$0xf0]  ;;  %v1335_v7 = vor.u32 %v1868_v1, %v1334_v0  ;;  %v1894_v8 = vld [vmem:[#allocation2 + $0x124] sm:$0xf]  ;;  %v1339_v10 = vor.u32 %v1866_v2, %v1336_v3 }
  0x1f   :  { %527 = vmatpush.bf16.msra.mxu2 %v1371_v50  ;;  %v1448_v9 = vld [vmem:[#allocation2 + $0x130] sm:$0xf0]  ;;  %v1463_v11 = vor.u32 %v1900_v5, %v1462_v4  ;;  %v1318_v12 = vld [vmem:[#allocation2 + $0x20] sm:$0xf]  ;;  %v1864_v13 = vld [vmem:[#allocation2 + $0x2c] sm:$0xf0] }
  0x20   :  { %514 = vmatpush.bf16.msra.mxu1 %v1495_v51  ;;  %v1862_v14 = vld [vmem:[#allocation2 + $0x24] sm:$0xf]  ;;  %v1320_v15 = vld [vmem:[#allocation2 + $0x30] sm:$0xf0]  ;;  %v1446_v16 = vld [vmem:[#allocation2 + $0x120] sm:$0xf]  ;;  %v1451_v18 = vor.u32 %v1894_v8, %v1448_v9  ;;  %v1319_v21 = vor.u32 %v1864_v13, %v1318_v12 }
  0x21   :  { %v1896_v17 = vld [vmem:[#allocation2 + $0x12c] sm:$0xf0]  ;;  %v1890_v19 = vld [vmem:[#allocation2 + $0x104] sm:$0xf]  ;;  %v1432_v20 = vld [vmem:[#allocation2 + $0x110] sm:$0xf0]  ;;  %v1323_v25 = vor.u32 %v1862_v14, %v1320_v15 }
  0x22   :  { %541 = vmatpush.bf16.msra.mxu3 %v1483_v58  ;;  %502 = vmatpush.bf16.msra.mxu0 %v1351_v59  ;;  %v1919_v22 = vld [vmem:[#allocation2 + $0x1ec] sm:$0xf]  ;;  %v1552_v23 = vld [vmem:[#allocation2 + $0x1f8] sm:$0xf0]  ;;  %v1302_v24 = vld [vmem:[#allocation2] sm:$0xf]  ;;  %v1447_v26 = vor.u32 %v1896_v17, %v1446_v16  ;;  %v1435_v33 = vor.u32 %v1890_v19, %v1432_v20 }
  0x23   :  { %528 = vmatpush.bf16.msra.mxu2 %v1355_v62  ;;  %v1860_v27 = vld [vmem:[#allocation2 + $0xc] sm:$0xf0]  ;;  %v1858_v28 = vld [vmem:[#allocation2 + $0x4] sm:$0xf]  ;;  %v1304_v29 = vld [vmem:[#allocation2 + $0x10] sm:$0xf0]  ;;  %v1555_v37 = vor.u32 %v1919_v22, %v1552_v23 }
  0x24   :  { %515 = vmatpush.bf16.msra.mxu1 %v1479_v63  ;;  %v1422_v30 = vld [vmem:[#allocation2 + $0xe8] sm:$0xf]  ;;  %v1889_v31 = vld [vmem:[#allocation2 + $0xf4] sm:$0xf0]  ;;  %v1887_v32 = vld [vmem:[#allocation2 + $0xec] sm:$0xf]  ;;  %v1303_v38 = vor.u32 %v1860_v27, %v1302_v24  ;;  %v1307_v41 = vor.u32 %v1858_v28, %v1304_v29 }
  0x25   :  { %v1424_v34 = vld [vmem:[#allocation2 + $0xf8] sm:$0xf0]  ;;  %v1430_v35 = vld [vmem:[#allocation2 + $0x100] sm:$0xf]  ;;  %v1892_v36 = vld [vmem:[#allocation2 + $0x10c] sm:$0xf0]  ;;  %v1423_v42 = vor.u32 %v1889_v31, %v1422_v30 }
  0x26   :  { %542 = vmatpush.bf16.msra.mxu3 %v1467_v6  ;;  %503 = vmatpush.bf16.msra.mxu0 %v1335_v7  ;;  %v1550_v39 = vld [vmem:[#allocation2 + $0x1e8] sm:$0xf]  ;;  %v1921_v40 = vld [vmem:[#allocation2 + $0x1f4] sm:$0xf0]  ;;  %v1915_v43 = vld [vmem:[#allocation2 + $0x1cc] sm:$0xf]  ;;  %v1427_v46 = vor.u32 %v1887_v32, %v1424_v34  ;;  %v1431_v47 = vor.u32 %v1892_v36, %v1430_v35 }
  0x27   :  { %529 = vmatpush.bf16.msra.mxu2 %v1339_v10  ;;  %v1536_v44 = vld [vmem:[#allocation2 + $0x1d8] sm:$0xf0]  ;;  %v1406_v45 = vld [vmem:[#allocation2 + $0xc8] sm:$0xf]  ;;  %v1885_v48 = vld [vmem:[#allocation2 + $0xd4] sm:$0xf0]  ;;  %v1551_v51 = vor.u32 %v1921_v40, %v1550_v39 }
  0x28   :  { %516 = vmatpush.bf16.msra.mxu1 %v1463_v11  ;;  %v1883_v49 = vld [vmem:[#allocation2 + $0xcc] sm:$0xf]  ;;  %v2187_v50 = vld [vmem:[%s2284_s1] sm:$0xff]  ;;  %v1408_v52 = vld [vmem:[#allocation2 + $0xd8] sm:$0xf0]  ;;  %v1539_v55 = vor.u32 %v1915_v43, %v1536_v44  ;;  %v1407_v56 = vor.u32 %v1885_v48, %v1406_v45 }
  0x29   :  { %v1534_v53 = vld [vmem:[#allocation2 + $0x1c8] sm:$0xf]  ;;  %v1917_v54 = vld [vmem:[#allocation2 + $0x1d4] sm:$0xf0]  ;;  %v1911_v57 = vld [vmem:[#allocation2 + $0x1ac] sm:$0xf]  ;;  %v2191_v59 = vpack.c.bf16 %v2187_v50, %v2187_v50  ;;  %v1411_v60 = vor.u32 %v1883_v49, %v1408_v52 }
  0x2a   :  { %543 = vmatpush.bf16.msra.mxu3 %v1451_v18  ;;  %504 = vmatpush.bf16.msra.mxu0 %v1319_v21  ;;  %v1520_v58 = vld [vmem:[#allocation2 + $0x1b8] sm:$0xf0]  ;;  %v1390_v61 = vld [vmem:[#allocation2 + $0xa8] sm:$0xf]  ;;  %v1881_v62 = vld [vmem:[#allocation2 + $0xb4] sm:$0xf0]  ;;  %v1535_v63 = vor.u32 %v1917_v54, %v1534_v53 }
  0x2b   :  { %530 = vmatpush.bf16.msra.mxu2 %v1323_v25  ;;  %v1879_v0 = vld [vmem:[#allocation2 + $0xac] sm:$0xf]  ;;  %v1392_v1 = vld [vmem:[#allocation2 + $0xb8] sm:$0xf0]  ;;  %v1523_v2 = vor.u32 %v1911_v57, %v1520_v58  ;;  %v1518_v3 = vld [vmem:[#allocation2 + $0x1a8] sm:$0xf]  ;;  %v1391_v5 = vor.u32 %v1881_v62, %v1390_v61 }
  0x2c   :  { %517 = vmatpush.bf16.msra.mxu1 %v1447_v26  ;;  %v1913_v4 = vld [vmem:[#allocation2 + $0x1b4] sm:$0xf0]  ;;  %v1907_v6 = vld [vmem:[#allocation2 + $0x18c] sm:$0xf]  ;;  %v1504_v7 = vld [vmem:[#allocation2 + $0x198] sm:$0xf0]  ;;  %v1395_v8 = vor.u32 %v1879_v0, %v1392_v1 }
  0x2d   :  { %v1374_v9 = vld [vmem:[#allocation2 + $0x88] sm:$0xf]  ;;  %v1877_v10 = vld [vmem:[#allocation2 + $0x94] sm:$0xf0]  ;;  %v1519_v11 = vor.u32 %v1913_v4, %v1518_v3  ;;  %v1875_v12 = vld [vmem:[#allocation2 + $0x8c] sm:$0xf]  ;;  %v1507_v14 = vor.u32 %v1907_v6, %v1504_v7  ;;  %v93_v6 = vlaneseq }
  0x2e   :  { %544 = vmatpush.bf16.msra.mxu3 %v1435_v33  ;;  %505 = vmatpush.bf16.msra.mxu0 %v1303_v38  ;;  %v1376_v13 = vld [vmem:[#allocation2 + $0x98] sm:$0xf0]  ;;  %v1375_v15 = vor.u32 %v1877_v10, %v1374_v9  ;;  %v1502_v17 = vld [vmem:[#allocation2 + $0x188] sm:$0xf]  ;;  %v1909_v18 = vld [vmem:[#allocation2 + $0x194] sm:$0xf0] }
  0x2f   :  { %531 = vmatpush.bf16.msra.mxu2 %v1307_v41  ;;  %v1379_v16 = vor.u32 %v1875_v12, %v1376_v13  ;;  %v1903_v19 = vld [vmem:[#allocation2 + $0x16c] sm:$0xf]  ;;  %v1503_v20 = vor.u32 %v1909_v18, %v1502_v17  ;;  %v1488_v21 = vld [vmem:[#allocation2 + $0x178] sm:$0xf0]  ;;  %v1358_v23 = vld [vmem:[#allocation2 + $0x68] sm:$0xf] }
  0x30   :  { %518 = vmatpush.bf16.msra.mxu1 %v1431_v47  ;;  %v1491_v22 = vor.u32 %v1903_v19, %v1488_v21  ;;  %v1873_v24 = vld [vmem:[#allocation2 + $0x74] sm:$0xf0]  ;;  %v1871_v25 = vld [vmem:[#allocation2 + $0x6c] sm:$0xf]  ;;  %v1360_v27 = vld [vmem:[#allocation2 + $0x78] sm:$0xf0] }
  0x31   :  { %545 = vmatmul.bf16.vlgmr.msra.gmra.mxu3 %v2191_v59  ;;  %v1359_v26 = vor.u32 %v1873_v24, %v1358_v23  ;;  %v1363_v28 = vor.u32 %v1871_v25, %v1360_v27  ;;  %v1486_v29 = vld [vmem:[#allocation2 + $0x168] sm:$0xf]  ;;  %v1905_v30 = vld [vmem:[#allocation2 + $0x174] sm:$0xf0]  ;;  %v1899_v31 = vld [vmem:[#allocation2 + $0x14c] sm:$0xf] }
  0x32   :  { %589 = vmatpush.bf16.msrb.mxu3 %v1555_v37  ;;  %550 = vmatpush.bf16.msrb.mxu0 %v1423_v42  ;;  %v1487_v32 = vor.u32 %v1905_v30, %v1486_v29  ;;  %v1472_v33 = vld [vmem:[#allocation2 + $0x158] sm:$0xf0]  ;;  %v1342_v34 = vld [vmem:[#allocation2 + $0x48] sm:$0xf]  ;;  %v1869_v35 = vld [vmem:[#allocation2 + $0x54] sm:$0xf0] }
  0x33   :  { %576 = vmatpush.bf16.msrb.mxu2 %v1427_v46  ;;  %519 = vmatmul.bf16.vlgmr.msra.gmra.mxu1 %v2191_v59  ;;  %v1475_v36 = vor.u32 %v1899_v31, %v1472_v33  ;;  %v1343_v37 = vor.u32 %v1869_v35, %v1342_v34  ;;  %v1867_v38 = vld [vmem:[#allocation2 + $0x4c] sm:$0xf]  ;;  %v1344_v39 = vld [vmem:[#allocation2 + $0x58] sm:$0xf0]  ;;  %v1470_v40 = vld [vmem:[#allocation2 + $0x148] sm:$0xf] }
  0x34   :  { %563 = vmatpush.bf16.msrb.mxu1 %v1551_v51  ;;  %v1347_v41 = vor.u32 %v1867_v38, %v1344_v39  ;;  %v1901_v42 = vld [vmem:[#allocation2 + $0x154] sm:$0xf0]  ;;  %v1895_v43 = vld [vmem:[#allocation2 + $0x12c] sm:$0xf]  ;;  %v1456_v44 = vld [vmem:[#allocation2 + $0x138] sm:$0xf0] }
  0x35   :  { %v1471_v45 = vor.u32 %v1901_v42, %v1470_v40  ;;  %v1459_v46 = vor.u32 %v1895_v43, %v1456_v44  ;;  %v1326_v47 = vld [vmem:[#allocation2 + $0x28] sm:$0xf]  ;;  %v1865_v48 = vld [vmem:[#allocation2 + $0x34] sm:$0xf0]  ;;  %v1863_v49 = vld [vmem:[#allocation2 + $0x2c] sm:$0xf] }
  0x36   :  { %590 = vmatpush.bf16.msrb.mxu3 %v1539_v55  ;;  %551 = vmatpush.bf16.msrb.mxu0 %v1407_v56  ;;  %v1327_v51 = vor.u32 %v1865_v48, %v1326_v47  ;;  %v1328_v52 = vld [vmem:[#allocation2 + $0x38] sm:$0xf0]  ;;  %v1454_v53 = vld [vmem:[#allocation2 + $0x128] sm:$0xf]  ;;  %v1897_v54 = vld [vmem:[#allocation2 + $0x134] sm:$0xf0] }
  0x37   :  { %577 = vmatpush.bf16.msrb.mxu2 %v1411_v60  ;;  %v1331_v55 = vor.u32 %v1863_v49, %v1328_v52  ;;  %v1891_v56 = vld [vmem:[#allocation2 + $0x10c] sm:$0xf]  ;;  %v1440_v57 = vld [vmem:[#allocation2 + $0x118] sm:$0xf0]  ;;  %v1310_v58 = vld [vmem:[#allocation2 + $0x8] sm:$0xf]  ;;  %v1455_v60 = vor.u32 %v1897_v54, %v1454_v53 }
  0x38   :  { %564 = vmatpush.bf16.msrb.mxu1 %v1535_v63  ;;  %v1861_v61 = vld [vmem:[#allocation2 + $0x14] sm:$0xf0]  ;;  %v1859_v62 = vld [vmem:[#allocation2 + $0xc] sm:$0xf]  ;;  %v1312_v63 = vld [vmem:[#allocation2 + $0x18] sm:$0xf0]  ;;  %v1443_v0 = vor.u32 %v1891_v56, %v1440_v57 }
  0x39   :  { %v1438_v1 = vld [vmem:[#allocation2 + $0x108] sm:$0xf]  ;;  %v1311_v3 = vor.u32 %v1861_v61, %v1310_v58  ;;  %v1315_v4 = vor.u32 %v1859_v62, %v1312_v63  ;;  %v94_v7 = vand.u32 127, %v93_v6  ;;  %v2111_v9 = vmov 1.0|1.0  }
  0x3a   :  { %591 = vmatpush.bf16.msrb.mxu3 %v1523_v2  ;;  %552 = vmatpush.bf16.msrb.mxu0 %v1391_v5  ;;  %v1893_v2 = vld [vmem:[#allocation2 + $0x114] sm:$0xf0]  ;;  %v1982_v12 = vld [vmem:[#allocation4 + $0x1e4] sm:$0xf]  ;;  %v1811_v13 = vld [vmem:[#allocation4 + $0x1f0] sm:$0xf0] }
  0x3b   :  { %578 = vmatpush.bf16.msrb.mxu2 %v1395_v8  ;;  %v1439_v5 = vor.u32 %v1893_v2, %v1438_v1  ;;  %v1950_v17 = vld [vmem:[#allocation4 + $0xe4] sm:$0xf]  ;;  %v1683_v19 = vld [vmem:[#allocation4 + $0xf0] sm:$0xf0]  ;;  %v1809_v21 = vld [vmem:[#allocation4 + $0x1e0] sm:$0xf] }
  0x3c   :  { %565 = vmatpush.bf16.msrb.mxu1 %v1519_v11  ;;  %v1978_v24 = vld [vmem:[#allocation4 + $0x1c4] sm:$0xf]  ;;  %v1795_v25 = vld [vmem:[#allocation4 + $0x1d0] sm:$0xf0]  ;;  %v1665_v27 = vld [vmem:[#allocation4 + $0xc0] sm:$0xf] }
  0x3d   :  { %v1946_v29 = vld [vmem:[#allocation4 + $0xc4] sm:$0xf]  ;;  %v1667_v31 = vld [vmem:[#allocation4 + $0xd0] sm:$0xf0]  ;;  %v1793_v33 = vld [vmem:[#allocation4 + $0x1c0] sm:$0xf] }
  0x3e   :  { %592 = vmatpush.bf16.msrb.mxu3 %v1507_v14  ;;  %553 = vmatpush.bf16.msrb.mxu0 %v1375_v15  ;;  %v1814_v14 = vor.u32 %v1982_v12, %v1811_v13  ;;  %v1980_v34 = vld [vmem:[#allocation4 + $0x1cc] sm:$0xf0]  ;;  %v1974_v35 = vld [vmem:[#allocation4 + $0x1a4] sm:$0xf]  ;;  %v1649_v40 = vld [vmem:[#allocation4 + $0xa0] sm:$0xf] }
  0x3f   :  { %579 = vmatpush.bf16.msrb.mxu2 %v1379_v16  ;;  %v1681_v16 = vld [vmem:[#allocation4 + $0xe0] sm:$0xf]  ;;  %v1942_v42 = vld [vmem:[#allocation4 + $0xa4] sm:$0xf]  ;;  %v1651_v44 = vld [vmem:[#allocation4 + $0xb0] sm:$0xf0] }
  0x40   :  { %566 = vmatpush.bf16.msrb.mxu1 %v1503_v20  ;;  %v1686_v20 = vor.u32 %v1950_v17, %v1683_v19  ;;  %v1976_v47 = vld [vmem:[#allocation4 + $0x1ac] sm:$0xf0]  ;;  %v1970_v48 = vld [vmem:[#allocation4 + $0x184] sm:$0xf]  ;;  %v1633_v53 = vld [vmem:[#allocation4 + $0x80] sm:$0xf] }
  0x41   :  { %v1940_v54 = vld [vmem:[#allocation4 + $0x8c] sm:$0xf0]  ;;  %v1938_v56 = vld [vmem:[#allocation4 + $0x84] sm:$0xf]  ;;  %v1635_v57 = vld [vmem:[#allocation4 + $0x90] sm:$0xf0] }
  0x42   :  { %593 = vmatpush.bf16.msrb.mxu3 %v1491_v22  ;;  %554 = vmatpush.bf16.msrb.mxu0 %v1359_v26  ;;  %v1984_v22 = vld [vmem:[#allocation4 + $0x1ec] sm:$0xf0]  ;;  %v1798_v26 = vor.u32 %v1978_v24, %v1795_v25  ;;  %v1638_v58 = vor.u32 %v1938_v56, %v1635_v57  ;;  %v1966_v62 = vld [vmem:[#allocation4 + $0x164] sm:$0xf]  ;;  %v1747_v1 = vld [vmem:[#allocation4 + $0x170] sm:$0xf0] }
  0x43   :  { %580 = vmatpush.bf16.msrb.mxu2 %v1363_v28  ;;  %v1810_v23 = vor.u32 %v1984_v22, %v1809_v21  ;;  %v1948_v28 = vld [vmem:[#allocation4 + $0xcc] sm:$0xf0]  ;;  %v1750_v2 = vor.u32 %v1966_v62, %v1747_v1  ;;  %v1601_v17 = vld [vmem:[#allocation4 + $0x40] sm:$0xf]  ;;  %v1930_v19 = vld [vmem:[#allocation4 + $0x44] sm:$0xf] }
  0x44   :  { %567 = vmatpush.bf16.msrb.mxu1 %v1487_v32  ;;  %v1666_v30 = vor.u32 %v1948_v28, %v1665_v27  ;;  %v1670_v32 = vor.u32 %v1946_v29, %v1667_v31  ;;  %v1972_v61 = vld [vmem:[#allocation4 + $0x18c] sm:$0xf0]  ;;  %v1603_v21 = vld [vmem:[#allocation4 + $0x50] sm:$0xf0]  ;;  %v2208_v22 = vld [vmem:[%s2286_s3] sm:$0xf] }
  0x45   :  { %v1968_v12 = vld [vmem:[#allocation4 + $0x16c] sm:$0xf0]  ;;  %v1729_v24 = vld [vmem:[#allocation4 + $0x140] sm:$0xf]  ;;  %v1958_v27 = vld [vmem:[#allocation4 + $0x124] sm:$0xf] }
  0x46   :  { %594 = vmatpush.bf16.msrb.mxu3 %v1475_v36  ;;  %555 = vmatpush.bf16.msrb.mxu0 %v1343_v37  ;;  %v1794_v36 = vor.u32 %v1980_v34, %v1793_v33  ;;  %v1779_v37 = vld [vmem:[#allocation4 + $0x1b0] sm:$0xf0]  ;;  %v1964_v25 = vld [vmem:[#allocation4 + $0x14c] sm:$0xf0]  ;;  %v1585_v31 = vld [vmem:[#allocation4 + $0x20] sm:$0xf] }
  0x47   :  { %581 = vmatpush.bf16.msrb.mxu2 %v1347_v41  ;;  %v1782_v39 = vor.u32 %v1974_v35, %v1779_v37  ;;  %v1944_v41 = vld [vmem:[#allocation4 + $0xac] sm:$0xf0]  ;;  %v1715_v28 = vld [vmem:[#allocation4 + $0x130] sm:$0xf0]  ;;  %v1926_v33 = vld [vmem:[#allocation4 + $0x24] sm:$0xf] }
  0x48   :  { %568 = vmatpush.bf16.msrb.mxu1 %v1471_v45  ;;  %v1650_v43 = vor.u32 %v1944_v41, %v1649_v40  ;;  %v1654_v45 = vor.u32 %v1942_v42, %v1651_v44  ;;  %v170_v34 = vperm.slane %v2208_v22, 0  ;;  %v1960_v40 = vld [vmem:[#allocation4 + $0x12c] sm:$0xf0]  ;;  %v1954_v41 = vld [vmem:[#allocation4 + $0x104] sm:$0xf] }
  0x49   :  { %v1983_v44 = vld [vmem:[#allocation4 + $0x1ec] sm:$0xf]  ;;  %v1953_v56 = vld [vmem:[#allocation4 + $0xf4] sm:$0xf0]  ;;  %v1691_v62 = vld [vmem:[#allocation4 + $0xf8] sm:$0xf0] }
  0x4a   :  { %595 = vmatpush.bf16.msrb.mxu3 %v1459_v46  ;;  %556 = vmatpush.bf16.msrb.mxu0 %v1327_v51  ;;  %v1777_v46 = vld [vmem:[#allocation4 + $0x1a0] sm:$0xf]  ;;  %v1763_v51 = vld [vmem:[#allocation4 + $0x190] sm:$0xf0] }
  0x4b   :  { %582 = vmatpush.bf16.msrb.mxu2 %v1331_v55  ;;  %v1778_v49 = vor.u32 %v1976_v47, %v1777_v46  ;;  %v1766_v52 = vor.u32 %v1970_v48, %v1763_v51  ;;  %v1634_v55 = vor.u32 %v1940_v54, %v1633_v53  ;;  %v1569_v48 = vld [vmem:[#allocation4] sm:$0xf]  ;;  %v1922_v51 = vld [vmem:[#allocation4 + $0x4] sm:$0xf]  ;;  %v1571_v54 = vld [vmem:[#allocation4 + $0x10] sm:$0xf0] }
  0x4c   :  { %569 = vmatpush.bf16.msrb.mxu1 %v1455_v60  ;;  %v1761_v60 = vld [vmem:[#allocation4 + $0x180] sm:$0xf] }
  0x4e   :  { %596 = vmatpush.bf16.msrb.mxu3 %v1443_v0  ;;  %557 = vmatpush.bf16.msrb.mxu0 %v1311_v3  ;;  %v1762_v0 = vor.u32 %v1972_v61, %v1761_v60  ;;  %v1617_v3 = vld [vmem:[#allocation4 + $0x60] sm:$0xf]  ;;  %v1951_v61 = vld [vmem:[#allocation4 + $0xec] sm:$0xf] }
  0x4f   :  { %583 = vmatpush.bf16.msrb.mxu2 %v1315_v4  ;;  %v1936_v4 = vld [vmem:[#allocation4 + $0x6c] sm:$0xf0]  ;;  %v1694_v1 = vor.u32 %v1951_v61, %v1691_v62 }
  0x50   :  { %570 = vmatpush.bf16.msrb.mxu1 %v1439_v5  ;;  %v1934_v5 = vld [vmem:[#allocation4 + $0x64] sm:$0xf]  ;;  %v1618_v6 = vor.u32 %v1936_v4, %v1617_v3  ;;  %v1817_v3 = vld [vmem:[#allocation4 + $0x1e8] sm:$0xf]  ;;  %v1985_v4 = vld [vmem:[#allocation4 + $0x1f4] sm:$0xf0] }
  0x51   :  { %597 = vmatmul.bf16.vlgmr.msrb.gmra.mxu3 %v2191_v59 }
  0x52   :  { %1090 = vmatpush.bf16.msra.mxu3 %v1814_v14  ;;  %v1962_v14 = vld [vmem:[#allocation4 + $0x144] sm:$0xf] }
  0x53   :  { %571 = vmatmul.bf16.vlgmr.msrb.gmra.mxu1 %v2191_v59  ;;  %v1952_v59 = vld [vmem:[#allocation4 + $0xec] sm:$0xf0] }
  0x54   :  { %v1682_v18 = vor.u32 %v1952_v59, %v1681_v16  ;;  %1064 = vmatpush.bf16.msra.mxu1 %v1810_v23  ;;  %v1731_v16 = vld [vmem:[#allocation4 + $0x150] sm:$0xf0]  ;;  %v1606_v23 = vor.u32 %v1930_v19, %v1603_v21  ;;  %v1675_v19 = vld [vmem:[#allocation4 + $0xd8] sm:$0xf0] }
  0x55   :  { %v1734_v59 = vor.u32 %v1962_v14, %v1731_v16  ;;  %v1673_v14 = vld [vmem:[#allocation4 + $0xc8] sm:$0xf]  ;;  %v1949_v16 = vld [vmem:[#allocation4 + $0xd4] sm:$0xf0] }
  0x56   :  { %1091 = vmatpush.bf16.msra.mxu3 %v1798_v26  ;;  %v1730_v26 = vor.u32 %v1964_v25, %v1729_v24  ;;  %v1975_v24 = vld [vmem:[#allocation4 + $0x1ac] sm:$0xf]  ;;  %v1787_v25 = vld [vmem:[#allocation4 + $0x1b8] sm:$0xf0] }
  0x58   :  { %1065 = vmatpush.bf16.msra.mxu1 %v1794_v36  ;;  %v1587_v36 = vld [vmem:[#allocation4 + $0x30] sm:$0xf0] }
  0x5a   :  { %1092 = vmatpush.bf16.msra.mxu3 %v1782_v39  ;;  %v1713_v39 = vld [vmem:[#allocation4 + $0x120] sm:$0xf] }
  0x5b   :  { %v1714_v42 = vor.u32 %v1960_v40, %v1713_v39  ;;  %v1977_v40 = vld [vmem:[#allocation4 + $0x1b4] sm:$0xf0] }
  0x5c   :  { %1066 = vmatpush.bf16.msra.mxu1 %v1778_v49  ;;  %v1924_v49 = vld [vmem:[#allocation4 + $0xc] sm:$0xf0] }
  0x5d   :  { %v1570_v53 = vor.u32 %v1924_v49, %v1569_v48  ;;  %v1643_v49 = vld [vmem:[#allocation4 + $0x98] sm:$0xf0] }
  0x5e   :  { %1093 = vmatpush.bf16.msra.mxu3 %v1766_v52 }
  0x60   :  { %1067 = vmatpush.bf16.msra.mxu1 %v1762_v0  ;;  %v1697_v0 = vld [vmem:[#allocation4 + $0x100] sm:$0xf] }
  0x62   :  { %1094 = vmatpush.bf16.msra.mxu3 %v1750_v2  ;;  %v1956_v2 = vld [vmem:[#allocation4 + $0x10c] sm:$0xf0] }
  0x66   :  { %1095 = vmatpush.bf16.msra.mxu3 %v1734_v59  ;;  %v1947_v59 = vld [vmem:[#allocation4 + $0xcc] sm:$0xf] }
  0x82   :  { %v97_v8 = vpop.permute.xlu0 %96 }
  0x83   :  { %vm98_vm0 = vcmp.eq.s32.totalorder %v94_v7, %v97_v8  ;;  %v1619_v7 = vld [vmem:[#allocation4 + $0x70] sm:$0xf0] }
  0x84   :  { %vm1556_vm1 = vmpackc.low %vm98_vm0, %vm98_vm0 }
  0x85   :  { %1557 = vmatmul.msk.bf16.vlgmr.msra.gmra.mxu0 %vm1556_vm1, %v2111_v9  ;;  %1559 = vmatmul.msk.bf16.vlgmr.msra.gmra.mxu2 %vm1556_vm1, %v2111_v9 }
  0x86   :  { %1051 = vmatpush.bf16.msra.mxu0 %v1682_v18  ;;  %1077 = vmatpush.bf16.msra.mxu2 %v1686_v20  ;;  %v1932_v18 = vld [vmem:[#allocation4 + $0x4c] sm:$0xf0] }
  0x87   :  { %v1602_v20 = vor.u32 %v1932_v18, %v1601_v17  ;;  %v1674_v18 = vor.u32 %v1949_v16, %v1673_v14  ;;  %v1739_v14 = vld [vmem:[#allocation4 + $0x158] sm:$0xf0]  ;;  %v1609_v16 = vld [vmem:[#allocation4 + $0x48] sm:$0xf] }
  0x8a   :  { %1052 = vmatpush.bf16.msra.mxu0 %v1666_v30  ;;  %1078 = vmatpush.bf16.msra.mxu2 %v1670_v32  ;;  %v1718_v30 = vor.u32 %v1958_v27, %v1715_v28  ;;  %v1928_v32 = vld [vmem:[#allocation4 + $0x2c] sm:$0xf0]  ;;  %v1790_v28 = vor.u32 %v1975_v24, %v1787_v25  ;;  %v172_v25 = vperm.slane %v2208_v22, 2 }
  0x8b   :  { %v1586_v35 = vor.u32 %v1928_v32, %v1585_v31  ;;  %v1943_v31 = vld [vmem:[#allocation4 + $0xac] sm:$0xf] }
  0x8c   :  { %1096 = vmatpush.bf16.msra.mxu3 %v1718_v30  ;;  %v1945_v30 = vld [vmem:[#allocation4 + $0xb4] sm:$0xf0] }
  0x8e   :  { %1053 = vmatpush.bf16.msra.mxu0 %v1650_v43  ;;  %1079 = vmatpush.bf16.msra.mxu2 %v1654_v45  ;;  %v1699_v43 = vld [vmem:[#allocation4 + $0x110] sm:$0xf0]  ;;  %v1819_v45 = vld [vmem:[#allocation4 + $0x1f8] sm:$0xf0] }
  0x8f   :  { %v1702_v46 = vor.u32 %v1954_v41, %v1699_v43  ;;  %v1822_v47 = vor.u32 %v1983_v44, %v1819_v45  ;;  %v1971_v41 = vld [vmem:[#allocation4 + $0x18c] sm:$0xf]  ;;  %v1641_v45 = vld [vmem:[#allocation4 + $0x88] sm:$0xf] }
  0x91   :  { %1097 = vmatpush.bf16.msra.mxu3 %v1702_v46  ;;  %v1941_v46 = vld [vmem:[#allocation4 + $0x94] sm:$0xf0] }
  0x92   :  { %1054 = vmatpush.bf16.msra.mxu0 %v1634_v55  ;;  %1080 = vmatpush.bf16.msra.mxu2 %v1638_v58  ;;  %v1689_v55 = vld [vmem:[#allocation4 + $0xe8] sm:$0xf]  ;;  %v1574_v58 = vor.u32 %v1922_v51, %v1571_v54  ;;  %v1967_v54 = vld [vmem:[#allocation4 + $0x16c] sm:$0xf] }
  0x93   :  { %v1690_v60 = vor.u32 %v1953_v56, %v1689_v55  ;;  %v1769_v51 = vld [vmem:[#allocation4 + $0x188] sm:$0xf]  ;;  %v1755_v55 = vld [vmem:[#allocation4 + $0x178] sm:$0xf0] }
  0x94   :  { %v1758_v61 = vor.u32 %v1967_v54, %v1755_v55  ;;  %v1925_v55 = vld [vmem:[#allocation4 + $0x14] sm:$0xf0] }
  0x95   :  { %1561 = vmatmul.msk.bf16.vlgmr.msrb.gmra.mxu0 %vm1556_vm1, %v2111_v9  ;;  %1563 = vmatmul.msk.bf16.vlgmr.msrb.gmra.mxu2 %vm1556_vm1, %v2111_v9  ;;  %v1622_v9 = vor.u32 %v1934_v5, %v1619_v7  ;;  %v1698_v7 = vor.u32 %v1956_v2, %v1697_v0  ;;  %v1625_v0 = vld [vmem:[#allocation4 + $0x68] sm:$0xf]  ;;  %v1935_v2 = vld [vmem:[#allocation4 + $0x6c] sm:$0xf] }
  0x96   :  { %1055 = vmatpush.bf16.msra.mxu0 %v1618_v6  ;;  %1142 = vmatpush.bf16.msrb.mxu3 %v1822_v47  ;;  %v171_v6 = vperm.slane %v2208_v22, 1  ;;  %v1939_v47 = vld [vmem:[#allocation4 + $0x8c] sm:$0xf] }
  0x97   :  { %1081 = vmatpush.bf16.msra.mxu2 %v1622_v9  ;;  %v1818_v9 = vor.u32 %v1985_v4, %v1817_v3  ;;  %v1627_v3 = vld [vmem:[#allocation4 + $0x78] sm:$0xf0]  ;;  %v173_v4 = vperm.slane %v2208_v22, 3 }
  0x98   :  { %v1595_v22 = vld [vmem:[#allocation4 + $0x38] sm:$0xf0] }
  0x9a   :  { %1056 = vmatpush.bf16.msra.mxu0 %v1602_v20  ;;  %v1801_v20 = vld [vmem:[#allocation4 + $0x1c8] sm:$0xf] }
  0x9b   :  { %1082 = vmatpush.bf16.msra.mxu2 %v1606_v23  ;;  %v1981_v23 = vld [vmem:[#allocation4 + $0x1d4] sm:$0xf0] }
  0x9c   :  { %v1802_v27 = vor.u32 %v1981_v23, %v1801_v20  ;;  %v1965_v23 = vld [vmem:[#allocation4 + $0x154] sm:$0xf0] }
  0x9e   :  { %1057 = vmatpush.bf16.msra.mxu0 %v1586_v35  ;;  %v2216_v35 = vld [vmem:[%s2284_s1 + $0x8] sm:$0xff] }
  0x9f   :  { %v2221_v39 = vpack.c.bf16 %v2216_v35, %v2216_v35 }
  0xa1   :  { %1098 = vmatmul.bf16.vlgmr.msra.gmra.mxu3 %v2221_v39 }
  0xa2   :  { %1058 = vmatpush.bf16.msra.mxu0 %v1570_v53  ;;  %v1973_v53 = vld [vmem:[#allocation4 + $0x194] sm:$0xf0] }
  0xa6   :  { %1103 = vmatpush.bf16.msrb.mxu0 %v1690_v60  ;;  %v1770_v60 = vor.u32 %v1973_v53, %v1769_v51  ;;  %v1577_v51 = vld [vmem:[#allocation4 + $0x8] sm:$0xf] }
  0xaa   :  { %1104 = vmatpush.bf16.msrb.mxu0 %v1674_v18  ;;  %v1933_v18 = vld [vmem:[#allocation4 + $0x54] sm:$0xf0] }
  0xab   :  { %v1610_v20 = vor.u32 %v1933_v18, %v1609_v16 }
  0xb0   :  { %v2197_v10 = vpop.f32.mrf.mxu1 }
  0xb4   :  { %v2199_v15 = vpop.f32.mrf.mxu3 }
  0xb8   :  { %v522_v11 = vpop.f32.mrf.mxu1 }
  0xb9   :  { %v1745_v11 = vld [vmem:[#allocation4 + $0x160] sm:$0xf] }
  0xba   :  { %v1746_v13 = vor.u32 %v1968_v12, %v1745_v11  ;;  %v1979_v11 = vld [vmem:[#allocation4 + $0x1cc] sm:$0xf]  ;;  %v1803_v12 = vld [vmem:[#allocation4 + $0x1d8] sm:$0xf0] }
  0xbc   :  { %v548_v38 = vpop.f32.mrf.mxu3  ;;  %1068 = vmatpush.bf16.msra.mxu1 %v1746_v13  ;;  %v1806_v13 = vor.u32 %v1979_v11, %v1803_v12 }
  0xbd   :  { %v1590_v38 = vor.u32 %v1926_v33, %v1587_v36  ;;  %v1785_v36 = vld [vmem:[#allocation4 + $0x1a8] sm:$0xf] }
  0xbe   :  { %1143 = vmatpush.bf16.msrb.mxu3 %v1806_v13  ;;  %v1786_v43 = vor.u32 %v1977_v40, %v1785_v36  ;;  %v1963_v13 = vld [vmem:[#allocation4 + $0x14c] sm:$0xf] }
  0xbf   :  { %1083 = vmatpush.bf16.msra.mxu2 %v1590_v38  ;;  %v1927_v40 = vld [vmem:[#allocation4 + $0x2c] sm:$0xf] }
  0xc0   :  { %1069 = vmatpush.bf16.msra.mxu1 %v1730_v26 }
  0xc2   :  { %1144 = vmatpush.bf16.msrb.mxu3 %v1790_v28 }
  0xc3   :  { %1084 = vmatpush.bf16.msra.mxu2 %v1574_v58 }
  0xc4   :  { %1070 = vmatpush.bf16.msra.mxu1 %v1714_v42  ;;  %v1771_v42 = vld [vmem:[#allocation4 + $0x198] sm:$0xf0] }
  0xc5   :  { %v1774_v44 = vor.u32 %v1971_v41, %v1771_v42 }
  0xc7   :  { %1129 = vmatpush.bf16.msrb.mxu2 %v1694_v1  ;;  %1145 = vmatpush.bf16.msrb.mxu3 %v1774_v44  ;;  %v1937_v1 = vld [vmem:[#allocation4 + $0x74] sm:$0xf0] }
  0xc8   :  { %1071 = vmatpush.bf16.msra.mxu1 %v1698_v7  ;;  %v1753_v7 = vld [vmem:[#allocation4 + $0x168] sm:$0xf] }
  0xcb   :  { %1072 = vmatmul.bf16.vlgmr.msra.gmra.mxu1 %v2221_v39  ;;  %1146 = vmatpush.bf16.msrb.mxu3 %v1758_v61 }
  0xcc   :  { %1116 = vmatpush.bf16.msrb.mxu1 %v1818_v9  ;;  %v1969_v9 = vld [vmem:[#allocation4 + $0x174] sm:$0xf0] }
  0xcd   :  { %v1754_v12 = vor.u32 %v1969_v9, %v1753_v7 }
  0xd0   :  { %v2201_v63 = vpop.f32.mrf.mxu1  ;;  %1117 = vmatpush.bf16.msrb.mxu1 %v1802_v27  ;;  %v1959_v27 = vld [vmem:[#allocation4 + $0x12c] sm:$0xf] }
  0xd4   :  { %v2203_v8 = vpop.f32.mrf.mxu3  ;;  %1118 = vmatpush.bf16.msrb.mxu1 %v1786_v43  ;;  %v2004_v43 = vld [vmem:[%s2287_s4] ss:$0 sm:$0xff] }
  0xd8   :  { %v574_v29 = vpop.f32.mrf.mxu1  ;;  %1119 = vmatpush.bf16.msrb.mxu1 %v1770_v60 }
  0xd9   :  { %v1657_v29 = vld [vmem:[#allocation4 + $0xa8] sm:$0xf] }
  0xda   :  { %v1658_v33 = vor.u32 %v1945_v30, %v1657_v29 }
  0xdc   :  { %v600_v37 = vpop.f32.mrf.mxu3  ;;  %1105 = vmatpush.bf16.msrb.mxu0 %v1658_v33  ;;  %1120 = vmatpush.bf16.msrb.mxu1 %v1754_v12  ;;  %v1929_v33 = vld [vmem:[#allocation4 + $0x34] sm:$0xf0] }
 0x102   :  { %v507_v52 = vpop.f32.mrf.mxu0 }
 0x103   :  { %v508_v57 = vadd.f32 %v507_v52, %v170_v34  ;;  %v1659_v34 = vld [vmem:[#allocation4 + $0xb8] sm:$0xf0]  ;;  %v1646_v52 = vor.u32 %v1939_v47, %v1643_v49  ;;  %v1961_v47 = vld [vmem:[#allocation4 + $0x134] sm:$0xf0] }
 0x104   :  { %v1662_v38 = vor.u32 %v1943_v31, %v1659_v34  ;;  %v1723_v31 = vld [vmem:[#allocation4 + $0x138] sm:$0xf0] }
 0x105   :  { %v521_v5 = vadd.f32 %v2197_v10, %v508_v57  ;;  %v1678_v10 = vor.u32 %v1947_v59, %v1675_v19  ;;  %v1931_v19 = vld [vmem:[#allocation4 + $0x4c] sm:$0xf]  ;;  %v1707_v49 = vld [vmem:[#allocation4 + $0x118] sm:$0xf0] }
 0x107   :  { %v1564_v17 = vmul.f32 -1.442695, %v521_v5  ;;  %1130 = vmatpush.bf16.msrb.mxu2 %v1678_v10  ;;  %v1626_v5 = vor.u32 %v1937_v1, %v1625_v0  ;;  %v1737_v10 = vld [vmem:[#allocation4 + $0x148] sm:$0xf]  ;;  %v1578_v0 = vor.u32 %v1925_v55, %v1577_v51 }
 0x108   :  { %v533_v21 = vpop.f32.mrf.mxu2  ;;  %v1705_v1 = vld [vmem:[#allocation4 + $0x108] sm:$0xf] }
 0x109   :  { %2007 = vpow2.f32 %v1564_v17  ;;  %v534_v26 = vadd.f32 %v533_v21, %v171_v6  ;;  %v1630_v6 = vor.u32 %v1935_v2, %v1627_v3  ;;  %v1742_v17 = vor.u32 %v1963_v13, %v1739_v14  ;;  %v1611_v21 = vld [vmem:[#allocation4 + $0x58] sm:$0xf0]  ;;  %v1957_v2 = vld [vmem:[#allocation4 + $0x114] sm:$0xf0] }
 0x10a   :  { %v509_v32 = vpop.f32.mrf.mxu0  ;;  %v1614_v30 = vor.u32 %v1931_v19, %v1611_v21 }
 0x10b   :  { %v547_v37 = vadd.f32 %v2199_v15, %v534_v26  ;;  %v1642_v15 = vor.u32 %v1941_v46, %v1641_v45  ;;  %1131 = vmatpush.bf16.msrb.mxu2 %v1662_v38  ;;  %1147 = vmatpush.bf16.msrb.mxu3 %v1742_v17  ;;  %v1593_v32 = vld [vmem:[#allocation4 + $0x28] sm:$0xf]  ;;  %v1726_v38 = vor.u32 %v1959_v27, %v1723_v31 }
 0x10c   :  { %v1594_v44 = vor.u32 %v1929_v33, %v1593_v32  ;;  %v1598_v45 = vor.u32 %v1927_v40, %v1595_v22  ;;  %v1721_v46 = vld [vmem:[#allocation4 + $0x128] sm:$0xf]  ;;  %v1990_v40 = vld [vmem:[#allocation6 + $0x20] sm:$0xff] }
 0x10d   :  { %v1565_v48 = vmul.f32 -1.442695, %v547_v37  ;;  %1106 = vmatpush.bf16.msrb.mxu0 %v1642_v15  ;;  %v1738_v37 = vor.u32 %v1965_v23, %v1737_v10  ;;  %v1955_v15 = vld [vmem:[#allocation4 + $0x10c] sm:$0xf] }
 0x10e   :  { %v1710_v54 = vor.u32 %v1955_v15, %v1707_v49  ;;  %v1991_v33 = vld [vmem:[#allocation6 + $0x28] sm:$0xff] }
 0x10f   :  { %v2008_v56 = vpop.eup %2007  ;;  %2009 = vpow2.f32 %v1565_v48  ;;  %1132 = vmatpush.bf16.msrb.mxu2 %v1646_v52  ;;  %1121 = vmatpush.bf16.msrb.mxu1 %v1738_v37  ;;  %v1722_v48 = vor.u32 %v1961_v47, %v1721_v46  ;;  %v1988_v46 = vld [vmem:[#allocation6 + $0x10] sm:$0xff]  ;;  %v1987_v15 = vld [vmem:[#allocation6 + $0x8] sm:$0xff] }
 0x110   :  { %v2225_v57 = vadd.f32 1.0, %v2008_v56  ;;  %v535_v58 = vpop.f32.mrf.mxu2  ;;  %1148 = vmatpush.bf16.msrb.mxu3 %v1726_v38  ;;  %v1923_v56 = vld [vmem:[#allocation4 + $0xc] sm:$0xf] }
 0x111   :  { %1107 = vmatpush.bf16.msrb.mxu0 %v1626_v5  ;;  %v1579_v58 = vld [vmem:[#allocation4 + $0x18] sm:$0xf0] }
 0x112   :  { %2011 = vrcp.f32 %v2225_v57  ;;  %v2228_v62 = vpop.f32.mrf.mxu0  ;;  %v615_v34 = vand.u32 2147483647, %v2225_v57  ;;  %v617_v42 = vand.u32 2147483648, %v2225_v57  ;;  %vm611_vm3 = vweird.f32 %v2225_v57 }
 0x113   :  { %1133 = vmatpush.bf16.msrb.mxu2 %v1630_v6  ;;  %v560_v61 = vadd.f32 %v2228_v62, %v172_v25  ;;  %1122 = vmatpush.bf16.msrb.mxu1 %v1722_v48  ;;  %v1706_v62 = vor.u32 %v1957_v2, %v1705_v1 }
 0x114   :  { %v618_v5 = vor.u32 1.1754944e-38, %v617_v42  ;;  %1149 = vmatpush.bf16.msrb.mxu3 %v1710_v54  ;;  %vm616_vm5 = vcmp.eq.f32.partialorder %v615_v34, 8.507059e+37  ;;  %v721_v34 = vld [vmem:[%s2289_s6] sm:$0xf]  ;;  %v1989_v42 = vld [vmem:[#allocation6 + $0x18] sm:$0xff] }
 0x115   :  { %v2010_v11 = vpop.eup %2009  ;;  %1108 = vmatpush.bf16.msrb.mxu0 %v1610_v20  ;;  %v573_v12 = vadd.f32 %v2201_v63, %v560_v61  ;;  %v723_v37 = vperm.slane %v721_v34, 0  ;;  %v726_v61 = vperm.slane %v721_v34, 3 }
 0x116   :  { %v2231_v59 = vadd.f32 1.0, %v2010_v11 }
 0x117   :  { %1134 = vmatpush.bf16.msrb.mxu2 %v1614_v30  ;;  %1150 = vmatmul.bf16.vlgmr.msrb.gmra.mxu3 %v2221_v39  ;;  %v1993_v30 = vld [vmem:[#allocation6 + $0x38] sm:$0xff] }
 0x118   :  { %v2233_v24 = vpop.eup %2011  ;;  %2013 = vrcp.f32 %v2231_v59  ;;  %v585_v26 = vpop.f32.mrf.mxu2  ;;  %v636_v16 = vand.u32 2147483648, %v2231_v59  ;;  %v634_v17 = vand.u32 2147483647, %v2231_v59  ;;  %1123 = vmatpush.bf16.msrb.mxu1 %v1706_v62  ;;  %vm630_vm7 = vweird.f32 %v2231_v59 }
 0x119   :  { %v607_v28 = vmul.f32 %v2233_v24, %v2225_v57  ;;  %v586_v29 = vadd.f32 %v585_v26, %v173_v4  ;;  %vm612_vm2 = vweird.f32 %v2233_v24  ;;  %1109 = vmatpush.bf16.msrb.mxu0 %v1594_v44  ;;  %v724_v44 = vperm.slane %v721_v34, 1 }
 0x11a   :  { %v561_v36 = vpop.f32.mrf.mxu0  ;;  %vm613_vm4 = vmor %vm611_vm3, %vm612_vm2  ;;  %v637_v20 = vor.u32 1.1754944e-38, %v636_v16  ;;  %vm635_vm9 = vcmp.eq.f32.partialorder %v634_v17, 8.507059e+37 }
 0x11b   :  { %v608_v41 = vsub.f32 1.0, %v607_v28  ;;  %v599_v52 = vadd.f32 %v2203_v8, %v586_v29  ;;  %1135 = vmatpush.bf16.msrb.mxu2 %v1598_v45  ;;  %v1582_v8 = vor.u32 %v1923_v56, %v1579_v58  ;;  %1124 = vmatmul.bf16.vlgmr.msrb.gmra.mxu1 %v2221_v39 }
 0x11d   :  { %v609_v53 = vmul.f32 %v2233_v24, %v608_v41  ;;  %v644_v11 = vadd.f32 %v2004_v43, %v599_v52  ;;  %1110 = vmatpush.bf16.msrb.mxu0 %v1578_v0 }
 0x11e   :  { %v2014_v60 = vpop.eup %2013 }
 0x11f   :  { %v626_v3 = vmul.f32 %v2014_v60, %v2231_v59  ;;  %v610_v4 = vadd.f32 %v2233_v24, %v609_v53  ;;  %vm631_vm6 = vweird.f32 %v2014_v60  ;;  %1136 = vmatpush.bf16.msrb.mxu2 %v1582_v8  ;;  %v1986_v53 = vld [vmem:[#allocation6] sm:$0xff]  ;;  %v725_v8 = vperm.slane %v721_v34, 2 }
 0x120   :  { %v587_v6 = vpop.f32.mrf.mxu2  ;;  %vm632_vm8 = vmor %vm630_vm7, %vm631_vm6 }
 0x121   :  { %v627_v7 = vsub.f32 1.0, %v626_v3  ;;  %v614_v9 = vsel %vm613_vm4, %v2233_v24, %v610_v4 }
 0x122   :  { %v619_v13 = vsel %vm616_vm5, %v618_v5, %v614_v9 }
 0x123   :  { %v628_v57 = vmul.f32 %v2014_v60, %v627_v7  ;;  %v645_v14 = vmul.f32 %v644_v11, %v619_v13 }
 0x124   :  { %v1099_v39 = vpop.f32.mrf.mxu3 }
 0x125   :  { %v646_v18 = vadd.f32 %v645_v14, %v573_v12  ;;  %v629_v19 = vadd.f32 %v2014_v60, %v628_v57  ;;  %v2005_v12 = vld [vmem:[%s2290_s7] ss:$0 sm:$0xff] }
 0x127   :  { %2015 = vtanh.f32 %v646_v18  ;;  %v633_v63 = vsel %vm632_vm8, %v2014_v60, %v629_v19 }
 0x128   :  { %v638_v21 = vsel %vm635_vm9, %v637_v20, %v633_v63 }
 0x129   :  { %v648_v10 = vsub.f32 1.0, %v638_v21  ;;  %v650_v25 = vmul.f32 %v638_v21, %v2187_v50  ;;  %v1992_v50 = vld [vmem:[#allocation6 + $0x30] sm:$0xff] }
 0x12c   :  { %v1101_v29 = vpop.f32.mrf.mxu3 }
 0x12d   :  { %v2016_v23 = vpop.eup %2015 }
 0x12e   :  { %v649_v24 = vmul.f32 %v2016_v23, %v648_v10 }
 0x130   :  { %v651_v26 = vadd.f32 %v650_v25, %v649_v24 }
 0x132   :  { %652 = vst [vmem:[%s2294_s11] sm:$0xff] %v651_v26  ;;  %v653_v59 = vpack.c.bf16 %v651_v26, %v651_v26 }
 0x134   :  { %1059 = vmatmul.bf16.vlgmr.msra.gmra.mxu0 %v653_v59  ;;  %1085 = vmatmul.bf16.vlgmr.msra.gmra.mxu2 %v653_v59 }
 0x135   :  { %1275 = vmatpush.bf16.msra.mxu0 %v1993_v30 }
 0x139   :  { %1276 = vmatpush.bf16.msra.mxu0 %v1992_v50 }
 0x13d   :  { %1277 = vmatpush.bf16.msra.mxu0 %v1991_v33 }
 0x141   :  { %1278 = vmatpush.bf16.msra.mxu0 %v1990_v40 }
 0x144   :  { %1111 = vmatmul.bf16.vlgmr.msrb.gmra.mxu0 %v653_v59  ;;  %1137 = vmatmul.bf16.vlgmr.msrb.gmra.mxu2 %v653_v59 }
 0x145   :  { %1279 = vmatpush.bf16.msra.mxu0 %v1989_v42 }
 0x148   :  { %v1073_v27 = vpop.f32.mrf.mxu1 }
 0x149   :  { %1280 = vmatpush.bf16.msra.mxu0 %v1988_v46 }
 0x14d   :  { %1281 = vmatpush.bf16.msra.mxu0 %v1987_v15 }
 0x150   :  { %v1075_v28 = vpop.f32.mrf.mxu1 }
 0x151   :  { %1282 = vmatpush.bf16.msra.mxu0 %v1986_v53 }
 0x198   :  { %v2264_v31 = vpop.f32.mrf.mxu1 }
 0x19a   :  { %v1151_v32 = vpop.f32.mrf.mxu3 }
 0x1a0   :  { %v1127_v36 = vpop.f32.mrf.mxu1 }
 0x1a1   :  { %v2006_v36 = vld [vmem:[%s2292_s9] ss:$0 sm:$0xff] }
 0x1a2   :  { %v1153_v38 = vpop.f32.mrf.mxu3 }
 0x1b1   :  { %v1060_v22 = vpop.f32.mrf.mxu0 }
 0x1b2   :  { %v1061_v41 = vadd.f32 %v1060_v22, %v723_v37 }
 0x1b4   :  { %v1074_v43 = vadd.f32 %v1073_v27, %v1061_v41 }
 0x1b6   :  { %v1823_v45 = vmul.f32 -1.442695, %v1074_v43 }
 0x1b7   :  { %v1086_v47 = vpop.f32.mrf.mxu2 }
 0x1b8   :  { %2017 = vpow2.f32 %v1823_v45  ;;  %v1087_v48 = vadd.f32 %v1086_v47, %v724_v44 }
 0x1b9   :  { %v1062_v49 = vpop.f32.mrf.mxu0 }
 0x1ba   :  { %v1100_v51 = vadd.f32 %v1099_v39, %v1087_v48 }
 0x1bc   :  { %v1824_v52 = vmul.f32 -1.442695, %v1100_v51 }
 0x1be   :  { %v2018_v54 = vpop.eup %2017  ;;  %2019 = vpow2.f32 %v1824_v52 }
 0x1bf   :  { %v1158_v55 = vadd.f32 1.0, %v2018_v54  ;;  %v1088_v56 = vpop.f32.mrf.mxu2 }
 0x1c1   :  { %2021 = vrcp.f32 %v1158_v55  ;;  %v1112_v58 = vpop.f32.mrf.mxu0  ;;  %v1170_v62 = vand.u32 2147483648, %v1158_v55  ;;  %v1168_v11 = vand.u32 2147483647, %v1158_v55  ;;  %vm1164_vm11 = vweird.f32 %v1158_v55 }
 0x1c2   :  { %v1113_v57 = vadd.f32 %v1112_v58, %v725_v8 }
 0x1c3   :  { %v1171_v17 = vor.u32 1.1754944e-38, %v1170_v62  ;;  %vm1169_vm13 = vcmp.eq.f32.partialorder %v1168_v11, 8.507059e+37 }
 0x1c4   :  { %v2020_v60 = vpop.eup %2019  ;;  %v1126_v21 = vadd.f32 %v2264_v31, %v1113_v57 }
 0x1c5   :  { %v1177_v0 = vadd.f32 1.0, %v2020_v60 }
 0x1c7   :  { %v2022_v1 = vpop.eup %2021  ;;  %2023 = vrcp.f32 %v1177_v0  ;;  %v1138_v2 = vpop.f32.mrf.mxu2  ;;  %v1189_v25 = vand.u32 2147483648, %v1177_v0  ;;  %v1187_v26 = vand.u32 2147483647, %v1177_v0  ;;  %vm1183_vm15 = vweird.f32 %v1177_v0 }
 0x1c8   :  { %v1160_v3 = vmul.f32 %v2022_v1, %v1158_v55  ;;  %v1139_v4 = vadd.f32 %v1138_v2, %v726_v61  ;;  %vm1165_vm10 = vweird.f32 %v2022_v1 }
 0x1c9   :  { %v1114_v5 = vpop.f32.mrf.mxu0  ;;  %vm1166_vm12 = vmor %vm1164_vm11, %vm1165_vm10  ;;  %v1190_v39 = vor.u32 1.1754944e-38, %v1189_v25  ;;  %vm1188_vm1 = vcmp.eq.f32.partialorder %v1187_v26, 8.507059e+37 }
 0x1ca   :  { %v1161_v6 = vsub.f32 1.0, %v1160_v3  ;;  %v1152_v7 = vadd.f32 %v1151_v32, %v1139_v4 }
 0x1cc   :  { %v1162_v9 = vmul.f32 %v2022_v1, %v1161_v6  ;;  %v1197_v20 = vadd.f32 %v2005_v12, %v1152_v7 }
 0x1cd   :  { %v2024_v13 = vpop.eup %2023 }
 0x1ce   :  { %v1179_v14 = vmul.f32 %v2024_v13, %v1177_v0  ;;  %v1163_v16 = vadd.f32 %v2022_v1, %v1162_v9  ;;  %vm1184_vm14 = vweird.f32 %v2024_v13 }
 0x1cf   :  { %v1140_v18 = vpop.f32.mrf.mxu2  ;;  %vm1185_vm0 = vmor %vm1183_vm15, %vm1184_vm14 }
 0x1d0   :  { %v1180_v19 = vsub.f32 1.0, %v1179_v14  ;;  %v1167_v63 = vsel %vm1166_vm12, %v2022_v1, %v1163_v16 }
 0x1d1   :  { %v1172_v10 = vsel %vm1169_vm13, %v1171_v17, %v1167_v63 }
 0x1d2   :  { %v1181_v23 = vmul.f32 %v2024_v13, %v1180_v19  ;;  %v1198_v24 = vmul.f32 %v1197_v20, %v1172_v10 }
 0x1d4   :  { %v1199_v59 = vadd.f32 %v1198_v24, %v1126_v21  ;;  %v1182_v27 = vadd.f32 %v2024_v13, %v1181_v23 }
 0x1d6   :  { %2025 = vtanh.f32 %v1199_v59  ;;  %v1186_v28 = vsel %vm1185_vm0, %v2024_v13, %v1182_v27 }
 0x1d7   :  { %v1191_v29 = vsel %vm1188_vm1, %v1190_v39, %v1186_v28 }
 0x1d8   :  { %v1201_v30 = vsub.f32 1.0, %v1191_v29  ;;  %v1203_v31 = vmul.f32 %v1191_v29, %v2216_v35 }
 0x1dc   :  { %v2026_v32 = vpop.eup %2025 }
 0x1dd   :  { %v1202_v50 = vmul.f32 %v2026_v32, %v1201_v30 }
 0x1df   :  { %v1204_v33 = vadd.f32 %v1203_v31, %v1202_v50 }
 0x1e1   :  { %1825 = vst [vmem:[%s2294_s11 + $0x8] sm:$0xff] %v1204_v33  ;;  %v1206_v34 = vpack.c.bf16 %v1204_v33, %v1204_v33 }
 0x1e3   :  { %1283 = vmatmul.bf16.vlgmr.msra.gmra.mxu0 %v1206_v34 }
 0x260   :  { %v1284_v37 = vpop.f32.mrf.mxu0 }
 0x261   :  { %v1285_v38 = vadd.f32 %v2006_v36, %v1284_v37 }
 0x263   :  { %1288 = vst [vmem:[%s2293_s10] sm:$0xff] %v1285_v38 }
 0x268   :  { %v1286_v40 = vpop.f32.mrf.mxu0 }
 0x269   :  { %1297 = vsyncpa [#allocation3], 1 }
 0x26a   :  { %1298 = vsyncpa [#allocation5], 1 }

</bundles_post_ra>
